<compile_context>
chip_gen: v7x
topology: tpu7x:2x2x1
jax: 0.10.0
libtpu: 0.0.40
codegen_flags: <defaults>
</compile_context>

<pallas_src>
import numpy as np
import jax
import jax.numpy as jnp
from jax.experimental import pallas as pl
from jax.experimental.pallas import tpu as pltpu


def xpos_kernel(pos_ref, x_ref, fused_ref, o_ref):
    """One (TM, W) row tile of the XPOS forward.

    pos_ref:   (TM, G+1) f32 - G packed-token positions per row + trailing 1.
    x_ref:     (TM, W)   input tile, W = G * head_dim (lane dense when packed).
    fused_ref: (G+1, 2W) host-baked constants so that pos @ fused gives
               [ sinusoid (sign-folded) | exp_arg ] with scale = exp(exp_arg).
    """
    W = x_ref.shape[-1]

    # One MXU dot yields both the sinusoid and the log-scale argument.
    # HIGHEST precision keeps f32 integer positions exact (phase correctness
    # for long sequences); K = G+1 is tiny so the cost is negligible.
    se = jax.lax.dot_general(
        pos_ref[...], fused_ref[...],
        dimension_numbers=(((1,), (0,)), ((), ())),
        precision=jax.lax.Precision.HIGHEST,
        preferred_element_type=jnp.float32)            # (TM, 2W)
    sinusoid = se[:, :W]
    sin = jnp.sin(sinusoid)    # even lanes already carry rotate_every_two's minus
    cos = jnp.cos(sinusoid)
    scale = jnp.exp(se[:, W:])

    # Combine in bf16 when activations are bf16 (v6e/v7x); f32 otherwise.
    # (On v5e pass f32 activations - its VPU has no bf16 path.)
    cdt = x_ref.dtype if x_ref.dtype == jnp.bfloat16 else jnp.float32
    x = x_ref[...].astype(cdt)

    # rotate_every_two via two XLU lane rolls + a parity select.
    # Pairs never cross head boundaries (head_dim even) and wrapped lanes are
    # never selected.  Mask is only (1, W); the select broadcasts it.
    roll_m1 = pltpu.roll(x, shift=W - 1, axis=1)       # y[l] = x[l+1]
    roll_p1 = pltpu.roll(x, shift=1, axis=1)           # y[l] = x[l-1]
    lane = jax.lax.broadcasted_iota(jnp.int32, (1, W), 1)
    rot = jnp.where((lane % 2) == 0, roll_m1, roll_p1)

    out = scale.astype(cdt) * (x * cos.astype(cdt) + rot * sin.astype(cdt))
    o_ref[...] = out.astype(o_ref.dtype)


def xpos_forward(x, positions, *, scale_base=512, downscale=False,
                 tile_rows=1024, target_width=512):
    """x: (N, L, D), positions: (N, L)  ->  (N, L, D)."""
    N, L, D = x.shape
    assert D % 2 == 0
    d = D // 2
    min_pos = -L // 2                      # matches PyTorch `-length // 2`
    expo_scale = (-1.0 if downscale else 1.0) / float(scale_base)
    rows = N * L

    # Lane packing: G consecutive tokens per row so the last dim is a large
    # multiple of 128 (lane-dense DMA + unmasked stores).
    if D % 128 == 0:
        G = max(1, target_width // D)
    elif 128 % D == 0:
        G = max(128, target_width) // D
    else:
        G = 1   # TODO(synk): lane-pad head_dim to a 128-multiple to avoid masked stores
    W = G * D

    x_flat = x.reshape(rows, D)
    pos_flat = positions.astype(jnp.float32).reshape(rows)
    pad = (-rows) % G
    if pad:                                # pad rows rather than unpacking
        x_flat = jnp.pad(x_flat, ((0, pad), (0, 0)))
        pos_flat = jnp.pad(pos_flat, ((0, pad),))
    R = (rows + pad) // G

    x2 = x_flat.reshape(R, W)
    # Packed-slot positions + a trailing ones column (carries the bias term).
    pos2 = jnp.concatenate(
        [pos_flat.reshape(R, G), jnp.ones((R, 1), jnp.float32)], axis=1)

    # Host-baked fused constant matrix (G+1, 2W):
    #   pos @ fused[:, :W]  = pos * signed_inv_freq   (sinusoid, sign-folded)
    #   pos @ fused[:, W:]  = pos * a + b, scale = exp(.) = base**((pos+min_pos)*expo_scale)
    m = np.arange(W) % D                       # lane index within a head
    k = (m // 2).astype(np.float64)            # frequency index
    inv_freq = 10000.0 ** (-k / d)
    signed_inv_freq = np.where(m % 2 == 0, -inv_freq, inv_freq)
    log_base = np.log((2.0 * k + 0.4 * D) / (1.4 * D))
    a = expo_scale * log_base
    b = float(min_pos) * expo_scale * log_base
    lane_token = np.arange(W) // D
    fused = np.zeros((G + 1, 2 * W), dtype=np.float64)
    for g in range(G):
        sel = lane_token == g
        fused[g, :W] = np.where(sel, signed_inv_freq, 0.0)
        fused[g, W:] = np.where(sel, a, 0.0)
    fused[G, W:] = b
    fused_j = jnp.asarray(fused.astype(np.float32))

    tile_rows = max(8, (int(tile_rows) // 8) * 8)
    TM = R if R <= tile_rows else tile_rows
    grid = (pl.cdiv(R, TM),)

    itemsize = jnp.dtype(x.dtype).itemsize
    cost = pl.CostEstimate(
        flops=int(2 * R * (G + 1) * 2 * W + 6 * R * W),
        transcendentals=int(3 * R * W),
        bytes_accessed=int(2 * R * W * itemsize + pos2.size * 4 + fused_j.size * 4))

    out2 = pl.pallas_call(
        xpos_kernel,
        out_shape=jax.ShapeDtypeStruct((R, W), x.dtype),
        grid=grid,
        in_specs=[
            pl.BlockSpec((TM, G + 1), lambda i: (i, 0)),     # positions (+1 col)
            pl.BlockSpec((TM, W), lambda i: (i, 0)),         # x tile
            pl.BlockSpec((G + 1, 2 * W), lambda i: (0, 0)),  # fused constants
        ],
        out_specs=pl.BlockSpec((TM, W), lambda i: (i, 0)),
        compiler_params=pltpu.CompilerParams(
            dimension_semantics=("parallel",),
            vmem_limit_bytes=50 * 1024 * 1024),
        cost_estimate=cost,
    )(pos2, x2, fused_j)

    out = out2.reshape(R * G, D)[:rows]
    return out.reshape(N, L, D)


def xpos_reference(x, positions, scale_base=512, downscale=False):
    """Pure-JAX mirror of the PyTorch forward, for verification."""
    N, L, D = x.shape
    d = D // 2
    min_pos = -L // 2
    scale_buf = (jnp.arange(0, D, 2, dtype=jnp.float32) + 0.4 * D) / (1.4 * D)
    scale = scale_buf[None, None, :] ** ((positions[..., None] + min_pos) / scale_base)
    inv_freq = 1.0 / (10000.0 ** (jnp.arange(0, d, dtype=jnp.float32) / d))
    sinusoid = positions[..., None] * inv_freq[None, None, :]
    sin, cos = jnp.sin(sinusoid), jnp.cos(sinusoid)
    if downscale:
        scale = 1.0 / scale
    sin_r = jnp.repeat(scale * sin, 2, axis=-1)
    cos_r = jnp.repeat(scale * cos, 2, axis=-1)
    x1 = x[:, :, 0::2]
    x2 = x[:, :, 1::2]
    rot = jnp.stack((-x2, x1), axis=-1).reshape(N, L, D)
    return x * cos_r + rot * sin_r


if __name__ == "__main__":
    key = jax.random.PRNGKey(0)
    k0, k1 = jax.random.split(key)
    N, L, head_dim = 2, 8, 32      # batch, seq length, head_dim (d = 16)

    x = jax.random.normal(k0, (N, L, head_dim), dtype=jnp.float32)
    positions = jnp.broadcast_to(
        jnp.arange(L, dtype=jnp.float32)[None, :], (N, L))

    out = jax.block_until_ready(
        xpos_forward(x, positions, scale_base=512, downscale=False))
    ref = xpos_reference(x, positions, scale_base=512, downscale=False)
    assert out.shape == (N, L, head_dim)
    assert out.dtype == x.dtype
    assert jnp.allclose(out, ref, rtol=1e-5, atol=1e-5), \
        float(jnp.max(jnp.abs(out - ref)))

    # Downscale path (negated exponent folded host-side).
    out_ds = jax.block_until_ready(
        xpos_forward(x, positions, scale_base=512, downscale=True))
    ref_ds = xpos_reference(x, positions, scale_base=512, downscale=True)
    assert jnp.allclose(out_ds, ref_ds, rtol=1e-5, atol=1e-5), \
        float(jnp.max(jnp.abs(out_ds - ref_ds)))

    # Row-padding path (rows not a multiple of the packing factor G).
    N2, L2 = 1, 7
    x_odd = jax.random.normal(k1, (N2, L2, head_dim), dtype=jnp.float32)
    pos_odd = jnp.broadcast_to(
        jnp.arange(L2, dtype=jnp.float32)[None, :], (N2, L2))
    out_odd = jax.block_until_ready(xpos_forward(x_odd, pos_odd))
    ref_odd = xpos_reference(x_odd, pos_odd)
    assert jnp.allclose(out_odd, ref_odd, rtol=1e-5, atol=1e-5), \
        float(jnp.max(jnp.abs(out_odd - ref_odd)))

    print("KERNEL_OK")
</pallas_src>

<mosaic_0001>
module attributes {stable_mosaic.version = 11 : i64} {
  func.func @xpos_kernel(%arg0: i32, %arg1: memref<1x17xf32, #tpu.memory_space<vmem>>, %arg2: memref<1x512xf32, #tpu.memory_space<vmem>>, %arg3: memref<17x1024xf32, #tpu.memory_space<vmem>>, %arg4: memref<1x512xf32, #tpu.memory_space<vmem>>) attributes {dimension_semantics = [#tpu.dimension_semantics<parallel>], iteration_bounds = array<i64: 1>, scalar_prefetch = 0 : i64, scratch_operands = 0 : i64, tpu.core_type = #tpu.core_type<tc>, window_params = [{transform_indices = @transform_0, window_bounds = array<i64: 1, 17>}, {transform_indices = @transform_1, window_bounds = array<i64: 1, 512>}, {pipeline_mode = #tpu.pipeline_mode<synchronous>, transform_indices = @transform_2, window_bounds = array<i64: 17, 1024>}, {transform_indices = @transform_3, window_bounds = array<i64: 1, 512>}]} {
    %c0 = arith.constant 0 : index
    %c0_0 = arith.constant 0 : index
    %0 = vector.load %arg1[%c0, %c0_0] : memref<1x17xf32, #tpu.memory_space<vmem>>, vector<1x17xf32>
    %c0_1 = arith.constant 0 : index
    %c0_2 = arith.constant 0 : index
    %1 = vector.load %arg3[%c0_1, %c0_2] : memref<17x1024xf32, #tpu.memory_space<vmem>>, vector<17x1024xf32>
    %cst = arith.constant dense<0.000000e+00> : vector<1x1024xf32>
    %2 = tpu.matmul %0, %1, %cst {dimension_numbers = #tpu.dot_dimension_numbers<[1], [0], [0], [1], [0, 0, 1, 1], [], []>, precision = #tpu.contract_precision<fp32>} : vector<1x17xf32>, vector<17x1024xf32>, vector<1x1024xf32> -> vector<1x1024xf32>
    %3 = vector.extract_strided_slice %2 {offsets = [0, 0], sizes = [1, 512], strides = [1, 1]} : vector<1x1024xf32> to vector<1x512xf32>
    %4 = math.sin %3 : vector<1x512xf32>
    %5 = math.cos %3 : vector<1x512xf32>
    %6 = vector.extract_strided_slice %2 {offsets = [0, 512], sizes = [1, 512], strides = [1, 1]} : vector<1x1024xf32> to vector<1x512xf32>
    %7 = math.exp %6 : vector<1x512xf32>
    %c0_3 = arith.constant 0 : index
    %c0_4 = arith.constant 0 : index
    %8 = vector.load %arg2[%c0_3, %c0_4] : memref<1x512xf32, #tpu.memory_space<vmem>>, vector<1x512xf32>
    %c511_i32 = arith.constant 511 : i32
    %9 = tpu.dynamic_rotate %8 by %c511_i32 dim 1 : vector<1x512xf32>, i32 -> vector<1x512xf32>
    %c1_i32 = arith.constant 1 : i32
    %10 = tpu.dynamic_rotate %8 by %c1_i32 dim 1 : vector<1x512xf32>, i32 -> vector<1x512xf32>
    %11 = tpu.iota {dimensions = array<i32: 1>} : vector<1x512xi32>
    %c2_i32 = arith.constant 2 : i32
    %c0_i32 = arith.constant 0 : i32
    %12 = arith.cmpi eq, %c2_i32, %c0_i32 : i32
    %c1_i32_5 = arith.constant 1 : i32
    %13 = arith.select %12, %c1_i32_5, %c2_i32 : i32
    %14 = vector.broadcast %13 : i32 to vector<1x512xi32>
    %15 = arith.remsi %11, %14 : vector<1x512xi32>
    %c0_i32_6 = arith.constant 0 : i32
    %16 = vector.broadcast %c0_i32_6 : i32 to vector<1x512xi32>
    %17 = arith.cmpi ne, %15, %16 : vector<1x512xi32>
    %c0_i32_7 = arith.constant 0 : i32
    %18 = vector.broadcast %c0_i32_7 : i32 to vector<1x512xi32>
    %19 = arith.cmpi slt, %15, %18 : vector<1x512xi32>
    %c0_i32_8 = arith.constant 0 : i32
    %20 = arith.cmpi slt, %13, %c0_i32_8 : i32
    %21 = vector.broadcast %20 : i1 to vector<1x512xi1>
    %22 = vector.broadcast %21 : vector<1x512xi1> to vector<1x512xi1>
    %23 = arith.xori %19, %22 : vector<1x512xi1>
    %24 = arith.andi %23, %17 : vector<1x512xi1>
    %25 = vector.broadcast %13 : i32 to vector<1x512xi32>
    %26 = arith.addi %15, %25 : vector<1x512xi32>
    %27 = arith.select %24, %26, %15 : vector<1x512xi1>, vector<1x512xi32>
    %c0_i32_9 = arith.constant 0 : i32
    %28 = vector.broadcast %c0_i32_9 : i32 to vector<1x512xi32>
    %29 = arith.cmpi eq, %27, %28 : vector<1x512xi32>
    %30 = arith.select %29, %9, %10 : vector<1x512xi1>, vector<1x512xf32>
    %31 = arith.mulf %8, %5 : vector<1x512xf32>
    %32 = arith.mulf %30, %4 : vector<1x512xf32>
    %33 = arith.addf %31, %32 : vector<1x512xf32>
    %34 = arith.mulf %7, %33 : vector<1x512xf32>
    %c0_10 = arith.constant 0 : index
    %c0_11 = arith.constant 0 : index
    %35 = vector.load %arg4[%c0_10, %c0_11] : memref<1x512xf32, #tpu.memory_space<vmem>>, vector<1x512xf32>
    tpu.vector_store %arg4[%c0_10, %c0_11], %34 {strides = array<i32>} : memref<1x512xf32, #tpu.memory_space<vmem>>, vector<1x512xf32>,
    return
  }
  func.func @transform_0(%arg0: i32) -> (i32, i32) {
    %c0_i32 = arith.constant 0 : i32
    %c0_i32_0 = arith.constant 0 : i32
    return %arg0, %c0_i32 : i32, i32
  }
  func.func @transform_1(%arg0: i32) -> (i32, i32) {
    %c0_i32 = arith.constant 0 : i32
    %c0_i32_0 = arith.constant 0 : i32
    return %arg0, %c0_i32 : i32, i32
  }
  func.func @transform_2(%arg0: i32) -> (i32, i32) {
    %c0_i32 = arith.constant 0 : i32
    %c0_i32_0 = arith.constant 0 : i32
    %c0_i32_1 = arith.constant 0 : i32
    return %c0_i32, %c0_i32_0 : i32, i32
  }
  func.func @transform_3(%arg0: i32) -> (i32, i32) {
    %c0_i32 = arith.constant 0 : i32
    %c0_i32_0 = arith.constant 0 : i32
    return %arg0, %c0_i32 : i32, i32
  }
}

</mosaic_0001>

<bundles_post_ra>
// kernel: tpu_custom_call.1
= control target key start
LH: loop header
LB: loop body
LE: loop exit
PB: predicated region body
PF: predicated region fallthrough
CT: control target
= control target key end

     0   :  { %8 = vsyncpa [#allocation3], 0  ;;  %s4498_s0 = inlined_call_operand.hbm [shape: f32[1,17], index: 0, kind: input, shape index: {}]   ;;  %s4499_s1 = inlined_call_operand.hbm [shape: f32[1,512], index: 1, kind: input, shape index: {}]   ;;  %s4500_s2 = inlined_call_operand.hbm [shape: f32[17,1024], index: 2, kind: input, shape index: {}]   ;;  %s4501_s3 = inlined_call_operand.hbm [shape: f32[1,512], index: 3, kind: output, shape index: {}]  }
   0x1   :  { %9 = vsyncpa [#allocation6], 0 }
   0x2   :  { %10 = vsyncpa [#allocation4], 0  ;;  %s3577_s12 = smov [#allocation5]   ;;  %s3578_s14 = smov [#allocation2]  }
   0x3   :  { %s27_s13 = sshll.u32 %s3577_s12, 4  ;;  %s17_s15 = sshll.u32 %s3578_s14, 4  ;;  %s28_s13 = int_to_ptr.vmem [resolvable:$true] %s27_s13  ;;  %s18_s15 = int_to_ptr.vmem [resolvable:$true] %s17_s15 }
   0x4   :  { %s3483_s18 = scalar_lea.hbm %s4499_s1, 64 }
   0x5   :  { %p3484_p0 = scmp.ne.s32.totalorder %s4499_s1, %s3483_s18  ;;  %p3487_p1 = scmp.lt.u32.totalorder %s3483_s18, %s4499_s1 }
   0x7   :  { %p3489_p2 = pnand %p3487_p1, %p3484_p0 }
   0x9   :  { %3492 = shalt.err (!%p3489_p2)
}
   0xa   :  { %s3493_s23 = scalar_lea.vmem %s28_s13, 64  ;;  %p3498_p4 = scmp.lt.s32.totalorder %s28_s13, %s28_s13 }
   0xb   :  { %p3494_p3 = scmp.ne.s32.totalorder %s28_s13, %s3493_s23  ;;  %p3499_p5 = scmp.lt.s32.totalorder %s3493_s23, %s3493_s23 }
   0xd   :  { %p3500_p6 = por %p3499_p5, %p3498_p4 }
   0xf   :  { %p3501_p7 = pnand %p3500_p6, %p3494_p3 }
  0x11   :  { %3504 = shalt.err (!%p3501_p7)
}
  0x12   :  { %30 = dma.hbm_to_vmem [thread:$0]  %s4499_s1, 64, %s28_s13, [#allocation6]  }
  0x13   :  { %s3505_s28 = scalar_lea.hbm %s4498_s0, 16 }
  0x14   :  { %p3506_p8 = scmp.ne.s32.totalorder %s4498_s0, %s3505_s28  ;;  %p3509_p9 = scmp.lt.u32.totalorder %s3505_s28, %s4498_s0 }
  0x16   :  { %p3511_p10 = pnand %p3509_p9, %p3506_p8 }
  0x18   :  { %3514 = shalt.err (!%p3511_p10)
}
  0x19   :  { %s3515_s6 = scalar_lea.vmem %s18_s15, 16  ;;  %s3519_s7 = scalar_lea.vmem %s18_s15, 32 }
  0x1a   :  { %p3516_p11 = scmp.ne.s32.totalorder %s18_s15, %s3515_s6  ;;  %p3520_p12 = scmp.lt.s32.totalorder %s18_s15, %s18_s15 }
  0x1b   :  { %p3521_p13 = scmp.lt.s32.totalorder %s3519_s7, %s3515_s6 }
  0x1d   :  { %p3522_p0 = por %p3521_p13, %p3520_p12 }
  0x1f   :  { %p3523_p1 = pnand %p3522_p0, %p3516_p11 }
  0x21   :  { %3526 = shalt.err (!%p3523_p1)
}
  0x22   :  { %20 = dma.hbm_to_vmem [thread:$0]  %s4498_s0, 16, %s18_s15, [#allocation3]  }
  0x23   :  { %s3579_s9 = smov [#allocation7]   ;;  %s3527_s13 = scalar_lea.hbm %s4500_s2, 3072 }
  0x24   :  { %s36_s10 = sshll.u32 %s3579_s9, 4  ;;  %p3528_p2 = scmp.ne.s32.totalorder %s4500_s2, %s3527_s13  ;;  %s37_s10 = int_to_ptr.vmem [resolvable:$true] %s36_s10 }
  0x25   :  { %p3531_p3 = scmp.lt.u32.totalorder %s3527_s13, %s4500_s2 }
  0x27   :  { %p3533_p4 = pnand %p3531_p3, %p3528_p2 }
  0x29   :  { %3536 = shalt.err (!%p3533_p4)
}
  0x2a   :  { %s3537_s19 = scalar_lea.vmem %s37_s10, 3072  ;;  %p3542_p6 = scmp.lt.s32.totalorder %s37_s10, %s37_s10 }
  0x2b   :  { %p3538_p5 = scmp.ne.s32.totalorder %s37_s10, %s3537_s19  ;;  %p3543_p7 = scmp.lt.s32.totalorder %s3537_s19, %s3537_s19 }
  0x2d   :  { %p3544_p8 = por %p3543_p7, %p3542_p6 }
  0x2f   :  { %p3545_p9 = pnand %p3544_p8, %p3538_p5 }
  0x31   :  { %3548 = shalt.err (!%p3545_p9)
}
  0x32   :  { %s3580_s0 = smov 1024   ;;  %s3581_s15 = smov 64  }
  0x33   :  { %42 = dma.hbm_to_vmem [thread:$0]  %s4500_s2, 3072, %s37_s10, [#allocation6], %s3580_s0, %s3580_s0, %s3581_s15  }
  0x34   :  { %3571 = dma.done.wait [#allocation3], 16  }
  0x35   :  { %3572 = vsyncadd [#allocation3], 4294967280 }
  0x36   :  { %3573 = dma.done.wait [#allocation6], 3136  }
  0x37   :  { %3574 = vsyncadd [#allocation6], 4294964160  ;;  %v3582_v0 = vmov 0.0   ;;  %v54_v1 = vld [vmem:[#allocation7 + $0x8] sm:$0xff]  ;;  %v56_v3 = vld [vmem:[#allocation7 + $0x18] sm:$0xff]  ;;  %vm81_vm0 = vcmask 1040384  }
  0x38   :  { %176 = vmatprep.mubr.f32.mxu0 %v3582_v0  ;;  %693 = vmatprep.mubr.f32.mxu1 %v3582_v0  ;;  %v62_v2 = vld [vmem:[#allocation7 + $0x48] sm:$0xff]  ;;  %v106_v4 = vand.u32 4294901760, %v54_v1  ;;  %v64_v6 = vld [vmem:[#allocation7 + $0x58] sm:$0xff]  ;;  %v623_v7 = vand.u32 4294901760, %v56_v3  ;;  %v53_v8 = vld [vmem:[#allocation7] sm:$0xff]  ;;  %vm77_vm1 = vcmask 138240  }
  0x39   :  { %v110_v5 = vand.u32 4294901760, %v62_v2  ;;  %v61_v9 = vld [vmem:[#allocation7 + $0x40] sm:$0xff]  ;;  %v627_v10 = vand.u32 4294901760, %v64_v6  ;;  %v108_v11 = vand.u32 4294901760, %v53_v8  ;;  %v55_v13 = vld [vmem:[#allocation7 + $0x10] sm:$0xff]  ;;  %s3583_s2 = smov 127  }
  0x3a   :  { %v112_v12 = vand.u32 4294901760, %v61_v9  ;;  %v63_v14 = vld [vmem:[#allocation7 + $0x50] sm:$0xff]  ;;  %v3653_v16 = vsub.f32 %v54_v1, %v106_v4  ;;  %v3657_v18 = vsub.f32 %v56_v3, %v623_v7  ;;  %v70_v19 = vld [vmem:[#allocation7 + $0x88] sm:$0x1]  ;;  %v72_v20 = vld [vmem:[#allocation7 + $0x98] sm:$0x1] }
  0x3b   :  { %v3651_v15 = vpack.c.bf16 %v110_v5, %v106_v4  ;;  %v3655_v17 = vsub.f32 %v62_v2, %v110_v5  ;;  %v69_v21 = vld [vmem:[#allocation7 + $0x80] sm:$0x1]  ;;  %v3659_v22 = vpack.c.bf16 %v627_v10, %v623_v7  ;;  %v3661_v23 = vsub.f32 %v64_v6, %v627_v10  ;;  %v71_v26 = vld [vmem:[#allocation7 + $0x90] sm:$0x1]  ;;  %v52_v31 = vld [vmem:[#allocation2] sm:$0x1] }
  0x3c   :  { %v3663_v24 = vpack.c.bf16 %v112_v12, %v108_v11  ;;  %v3665_v25 = vsub.f32 %v53_v8, %v108_v11  ;;  %v3668_v27 = vsub.f32 %v61_v9, %v112_v12  ;;  %v625_v28 = vand.u32 4294901760, %v55_v13  ;;  %s3584_s22 = smov 1   ;;  %s3592_s23 = smov [#allocation8]  }
  0x3d   :  { %3291 = vmatprep.subr.bf16.mxu0 %v3651_v15  ;;  %v629_v29 = vand.u32 4294901760, %v63_v14  ;;  %v86_v30 = vsel %vm81_vm0, %v70_v19, 0  ;;  %3315 = vmatprep.subr.bf16.mxu1 %v3659_v22  ;;  %v92_v33 = vsel %vm81_vm0, %v72_v20, 0  ;;  %v83_v34 = vsel %vm81_vm0, %v69_v21, 0  ;;  %s3248_s24 = sshll.u32 %s3592_s23, 4  ;;  %s3249_s24 = int_to_ptr.vmem [resolvable:$true] %s3248_s24 }
  0x3e   :  { %3293 = vmatpush1.bf16.msra.mxu0 %v3663_v24  ;;  %v3673_v32 = vand.u32 4294901760, %v86_v30  ;;  %v89_v35 = vsel %vm81_vm0, %v71_v26, 0  ;;  %v3680_v37 = vsub.f32 %v55_v13, %v625_v28  ;;  %v3684_v39 = vand.u32 4294901760, %v92_v33  ;;  %s3549_s25 = scalar_lea.vmem %s3249_s24, 64  ;;  %p3554_p11 = scmp.lt.s32.totalorder %s3249_s24, %s3249_s24 }
  0x3f   :  { %v3678_v36 = vpack.c.bf16 %v629_v29, %v625_v28  ;;  %v3682_v38 = vsub.f32 %v63_v14, %v629_v29  ;;  %v3687_v40 = vand.u32 4294901760, %v83_v34  ;;  %v3689_v41 = vand.u32 4294901760, %v89_v35  ;;  %p3550_p10 = scmp.ne.s32.totalorder %s3249_s24, %s3549_s25  ;;  %p3555_p12 = scmp.lt.s32.totalorder %s3549_s25, %s3549_s25 }
  0x40   :  { %115 = vmatprep.subr.mxu0 %v3673_v32  ;;  %v79_v42 = vsel %vm77_vm1, %v52_v31, 0  ;;  %v190_v43 = vand.u32 4294901760, %v3653_v16  ;;  %v202_v45 = vand.u32 4294901760, %v3655_v17  ;;  %v707_v46 = vand.u32 4294901760, %v3657_v18 }
  0x41   :  { %3317 = vmatpush1.bf16.msra.mxu1 %v3678_v36  ;;  %v3694_v44 = vand.u32 4294901760, %v79_v42  ;;  %v719_v47 = vand.u32 4294901760, %v3661_v23  ;;  %v3702_v48 = vsub.f32 %v83_v34, %v3687_v40  ;;  %v3705_v49 = vsub.f32 %v89_v35, %v3689_v41  ;;  %p3556_p13 = por %p3555_p12, %p3554_p11 }
  0x42   :  { %632 = vmatprep.subr.mxu1 %v3684_v39  ;;  %117 = vmatpush1.msra.mxu0 %v3687_v40  ;;  %v191_v50 = vsub.f32 %v3653_v16, %v190_v43  ;;  %v196_v51 = vand.u32 4294901760, %v3665_v25  ;;  %v203_v53 = vsub.f32 %v3655_v17, %v202_v45  ;;  %v708_v54 = vsub.f32 %v3657_v18, %v707_v46 }
  0x43   :  { %v3712_v52 = vsub.f32 %v79_v42, %v3694_v44  ;;  %v720_v55 = vsub.f32 %v3661_v23, %v719_v47  ;;  %v208_v58 = vand.u32 4294901760, %v3668_v27  ;;  %v713_v59 = vand.u32 4294901760, %v3680_v37  ;;  %p3557_p0 = pnand %p3556_p13, %p3550_p10 }
  0x44   :  { %v192_v56 = vand.u32 4294901760, %v191_v50  ;;  %v197_v57 = vsub.f32 %v3665_v25, %v196_v51  ;;  %v204_v61 = vand.u32 4294901760, %v203_v53  ;;  %v709_v62 = vand.u32 4294901760, %v708_v54 }
  0x45   :  { %634 = vmatpush1.msra.mxu1 %v3689_v41  ;;  %v3730_v60 = vand.u32 4294901760, %v3712_v52  ;;  %v721_v63 = vand.u32 4294901760, %v720_v55  ;;  %v209_v2 = vsub.f32 %v3668_v27, %v208_v58  ;;  %v714_v3 = vsub.f32 %v3680_v37, %v713_v59 }
  0x46   :  { %v198_v1 = vand.u32 4294901760, %v197_v57  ;;  %v725_v4 = vand.u32 4294901760, %v3682_v38  ;;  %v3294_v6 = vpack.c.bf16 %v204_v61, %v192_v56  ;;  %v3742_v8 = vsub.f32 %v86_v30, %v3673_v32 }
  0x47   :  { %v180_v5 = vsub.f32 %v3712_v52, %v3730_v60  ;;  %v3318_v7 = vpack.c.bf16 %v721_v63, %v709_v62  ;;  %v210_v9 = vand.u32 4294901760, %v209_v2  ;;  %v715_v10 = vand.u32 4294901760, %v714_v3  ;;  %v58_v2 = vld [vmem:[#allocation7 + $0x28] sm:$0xff] }
  0x48   :  { %v726_v11 = vsub.f32 %v3682_v38, %v725_v4  ;;  %v3748_v12 = vsub.f32 %v92_v33, %v3684_v39  ;;  %3295 = vmatprep.subr.bf16.mxu0 %v3294_v6  ;;  %v214_v14 = vand.u32 4294901760, %v3742_v8  ;;  %v220_v19 = vand.u32 4294901760, %v3702_v48  ;;  %v66_v3 = vld [vmem:[#allocation7 + $0x68] sm:$0xff]  ;;  %v68_v6 = vld [vmem:[#allocation7 + $0x78] sm:$0xff] }
  0x49   :  { %v3750_v13 = vand.u32 4294901760, %v180_v5  ;;  %3319 = vmatprep.subr.bf16.mxu1 %v3318_v7  ;;  %v737_v20 = vand.u32 4294901760, %v3705_v49  ;;  %v3296_v21 = vpack.c.bf16 %v210_v9, %v198_v1  ;;  %v3298_v50 = vpack.c.bf16 %v3655_v17, %v3653_v16  ;;  %v3809_v5 = vld [vmem:[#allocation7 + $0x38] sm:$0xff]  ;;  %v3811_v7 = vld [vmem:[#allocation7 + $0x20] sm:$0xff]  ;;  %v3829_v9 = vld [vmem:[#allocation7 + $0x70] sm:$0xff] }
  0x4a   :  { %v727_v26 = vand.u32 4294901760, %v726_v11  ;;  %v731_v28 = vand.u32 4294901760, %v3748_v12  ;;  %v215_v29 = vsub.f32 %v3742_v8, %v214_v14  ;;  %v221_v30 = vsub.f32 %v3702_v48, %v220_v19  ;;  %v3813_v16 = vld [vmem:[#allocation7 + $0x60] sm:$0xff] }
  0x4b   :  { %182 = vmatmul.mubr.f32.vlgmr.msra.gmra.mrb[0].mxu0 %v3750_v13  ;;  %699 = vmatmul.mubr.f32.vlgmr.msra.gmra.mrb[0].mxu1 %v3750_v13  ;;  %v738_v31 = vsub.f32 %v3705_v49, %v737_v20  ;;  %v3322_v55 = vpack.c.bf16 %v3661_v23, %v3657_v18  ;;  %v3300_v56 = vpack.c.bf16 %v3668_v27, %v3665_v25  ;;  %v3012_v61 = vlaneseq  ;;  %v74_v25 = vld [vmem:[#allocation7 + $0xa8] sm:$0x1] }
  0x4c   :  { %3297 = vmatpush1.bf16.msra.mxu0 %v3296_v21  ;;  %v3320_v33 = vpack.c.bf16 %v727_v26, %v715_v10  ;;  %v732_v34 = vsub.f32 %v3748_v12, %v731_v28  ;;  %282 = vmatprep.mubr.f32.mxu0 %v3582_v0  ;;  %v216_v35 = vand.u32 4294901760, %v215_v29  ;;  %v222_v42 = vand.u32 4294901760, %v221_v30  ;;  %v3010_v10 = vld [vmem:[#allocation5] sm:$0xf]  ;;  %v76_v21 = vld [vmem:[#allocation7 + $0xb8] sm:$0x1] }
  0x4d   :  { %799 = vmatprep.mubr.f32.mxu1 %v3582_v0  ;;  %v739_v54 = vand.u32 4294901760, %v738_v31  ;;  %v3324_v57 = vpack.c.bf16 %v3682_v38, %v3680_v37  ;;  %v3793_v62 = vshrl.u32 %v3012_v61, 7  ;;  %v3306_v63 = vpack.c.bf16 %v202_v45, %v190_v43  ;;  %v73_v38 = vld [vmem:[#allocation7 + $0xa0] sm:$0x1]  ;;  %v75_v31 = vld [vmem:[#allocation7 + $0xb0] sm:$0x1] }
  0x4e   :  { %3321 = vmatpush1.bf16.msra.mxu1 %v3320_v33  ;;  %v733_v53 = vand.u32 4294901760, %v732_v34  ;;  %217 = vmatprep.subr.mxu0 %v216_v35  ;;  %v3330_v1 = vpack.c.bf16 %v719_v47, %v707_v46  ;;  %v3308_v23 = vpack.c.bf16 %v208_v58, %v196_v51  ;;  %v3332_v43 = vpack.c.bf16 %v725_v4, %v713_v59  ;;  %v3827_v47 = vld [vmem:[#allocation7 + $0x30] sm:$0xff] }
  0x4f   :  { %v3022_v17 = vsub.s32 2, %v3793_v62  ;;  %v3014_v18 = vsub.s32 0, %v3793_v62  ;;  %v1140_v45 = vand.u32 4294901760, %v58_v2  ;;  %v1144_v46 = vand.u32 4294901760, %v66_v3 }
  0x50   :  { %734 = vmatprep.subr.mxu1 %v733_v53  ;;  %223 = vmatpush1.msra.mxu0 %v222_v42  ;;  %v1657_v11 = vand.u32 4294901760, %v3809_v5  ;;  %v1661_v27 = vand.u32 4294901760, %v68_v6  ;;  %v1142_v51 = vand.u32 4294901760, %v3811_v7  ;;  %v1146_v37 = vand.u32 4294901760, %v3813_v16 }
  0x51   :  { %3299 = vmatprep.subr.bf16.mxu0 %v3298_v50  ;;  %v1659_v58 = vand.u32 4294901760, %v3827_v47  ;;  %v1663_v59 = vand.u32 4294901760, %v3829_v9  ;;  %v3840_v4 = vrot.slane %v3010_v10, %v3022_v17  ;;  %v3844_v26 = vrot.slane %v3010_v10, %v3014_v18 }
  0x52   :  { %740 = vmatpush1.msra.mxu1 %v739_v54  ;;  %v3846_v29 = vsub.f32 %v58_v2, %v1140_v45  ;;  %v3848_v30 = vsub.f32 %v66_v3, %v1144_v46  ;;  %v3855_v33 = vsub.f32 %v3809_v5, %v1657_v11  ;;  %v98_v34 = vsel %vm81_vm0, %v74_v25, 0 }
  0x53   :  { %284 = vmatmul.mubr.f32.vlgmr.msra.gmra.mrb[0].mxu0 %v3694_v44  ;;  %801 = vmatmul.mubr.f32.vlgmr.msra.gmra.mrb[0].mxu1 %v3694_v44  ;;  %v104_v35 = vsel %vm81_vm0, %v76_v21, 0  ;;  %v95_v42 = vsel %vm81_vm0, %v73_v38, 0  ;;  %v3862_v50 = vsub.f32 %v68_v6, %v1661_v27  ;;  %v3883_v53 = vsub.f32 %v3829_v9, %v1663_v59 }
  0x54   :  { %3323 = vmatprep.subr.bf16.mxu1 %v3322_v55  ;;  %3301 = vmatpush1.bf16.msra.mxu0 %v3300_v56  ;;  %v101_v54 = vsel %vm81_vm0, %v75_v31, 0  ;;  %v3018_v55 = vsub.s32 1, %v3793_v62  ;;  %v3895_v56 = vpack.c.bf16 %v1144_v46, %v1140_v45  ;;  %v3905_v2 = vpack.c.bf16 %v1661_v27, %v1657_v11 }
  0x55   :  { %3325 = vmatpush1.bf16.msra.mxu1 %v3324_v57  ;;  %304 = vmatprep.subr.mxu0 %v3742_v8  ;;  %v3867_v8 = vsub.f32 %v3811_v7, %v1142_v51  ;;  %v3897_v57 = vand.u32 4294901760, %v98_v34  ;;  %v1753_v3 = vand.u32 4294901760, %v3862_v50  ;;  %v3976_v31 = vpack.c.bf16 %v1146_v37, %v1142_v51 }
  0x56   :  { %821 = vmatprep.subr.mxu1 %v3748_v12  ;;  %366 = vmatprep.mubr.f32.mxu0 %v3582_v0  ;;  %v3872_v12 = vsub.f32 %v3813_v16, %v1146_v37 }
  0x57   :  { %883 = vmatprep.mubr.f32.mxu1 %v3582_v0  ;;  %3036 = vrot.lane.b32.xlu1 %v3840_v4, %s3583_s2  ;;  %v1230_v5 = vand.u32 4294901760, %v3867_v8  ;;  %v3931_v46 = vsub.f32 %v98_v34, %v3897_v57  ;;  %v3982_v34 = vpack.c.bf16 %v1663_v59, %v1659_v58 }
  0x58   :  { %307 = vmatpush1.msra.mxu0 %v3702_v48  ;;  %3032 = vrot.lane.b32.xlu0 %v3844_v26, %s3583_s2  ;;  %v1224_v48 = vand.u32 4294901760, %v3846_v29  ;;  %v1242_v6 = vand.u32 4294901760, %v3872_v12 }
  0x59   :  { %824 = vmatpush1.msra.mxu1 %v3705_v49  ;;  %3303 = vmatprep.subr.bf16.mxu0 %v3651_v15  ;;  %v1741_v49 = vand.u32 4294901760, %v3855_v33 }
  0x5a   :  { %3327 = vmatprep.subr.bf16.mxu1 %v3659_v22  ;;  %v1243_v25 = vsub.f32 %v3872_v12, %v1242_v6 }
  0x5b   :  { %369 = vmatmul.mubr.f32.vlgmr.msra.gmra.mrb[0].mxu0 %v3712_v52  ;;  %886 = vmatmul.mubr.f32.vlgmr.msra.gmra.mrb[0].mxu1 %v3712_v52 }
  0x5c   :  { %3305 = vmatpush1.bf16.msra.mxu0 %v3663_v24  ;;  %3329 = vmatpush1.bf16.msra.mxu1 %v3678_v36  ;;  %v1244_v37 = vand.u32 4294901760, %v1243_v25 }
  0x5d   :  { %384 = vmatprep.subr.mxu0 %v3673_v32  ;;  %901 = vmatprep.subr.mxu1 %v3684_v39 }
  0x5e   :  { %445 = vmatprep.mubr.f32.mxu0 %v3582_v0  ;;  %962 = vmatprep.mubr.f32.mxu1 %v3582_v0 }
  0x60   :  { %386 = vmatpush1.msra.mxu0 %v3687_v40  ;;  %903 = vmatpush1.msra.mxu1 %v3689_v41 }
  0x61   :  { %3307 = vmatprep.subr.bf16.mxu0 %v3306_v63  ;;  %3331 = vmatprep.subr.bf16.mxu1 %v3330_v1  ;;  %v3899_v63 = vand.u32 4294901760, %v104_v35  ;;  %v3901_v1 = vand.u32 4294901760, %v95_v42 }
  0x63   :  { %449 = vmatmul.mubr.f32.vlgmr.msra.gmra.mrb[0].mxu0 %v3730_v60  ;;  %966 = vmatmul.mubr.f32.vlgmr.msra.gmra.mrb[0].mxu1 %v3730_v60  ;;  %v3928_v45 = vsub.f32 %v95_v42, %v3901_v1  ;;  %v3934_v11 = vsub.f32 %v104_v35, %v3899_v63  ;;  %v1248_v35 = vand.u32 4294901760, %v3931_v46 }
  0x64   :  { %3309 = vmatpush1.bf16.msra.mxu0 %v3308_v23  ;;  %3333 = vmatpush1.bf16.msra.mxu1 %v3332_v43  ;;  %v3019_v43 = vrot.slane %v3010_v10, %v3018_v55 }
  0x65   :  { %474 = vmatprep.subr.mxu0 %v214_v14  ;;  %991 = vmatprep.subr.mxu1 %v731_v28  ;;  %v3026_v14 = vsub.s32 3, %v3793_v62  ;;  %v3878_v28 = vsub.f32 %v3827_v47, %v1659_v58  ;;  %v1765_v42 = vand.u32 4294901760, %v3934_v11  ;;  %v1254_v58 = vand.u32 4294901760, %v3928_v45 }
  0x66   :  { %537 = vmatprep.mubr.f32.mxu0 %v3582_v0  ;;  %1054 = vmatprep.mubr.f32.mxu1 %v3582_v0 }
  0x67   :  { %v3921_v23 = vrot.slane %v3010_v10, %v3026_v14  ;;  %v1225_v10 = vsub.f32 %v3846_v29, %v1224_v48  ;;  %3034 = vrot.lane.b32.xlu0 %v3019_v43, %s3583_s2  ;;  %v1255_v25 = vsub.f32 %v3928_v45, %v1254_v58 }
  0x68   :  { %478 = vmatpush1.msra.mxu0 %v220_v19  ;;  %995 = vmatpush1.msra.mxu1 %v737_v20  ;;  %v1236_v19 = vand.u32 4294901760, %v3848_v30  ;;  %v3910_v20 = vand.u32 4294901760, %v101_v54 }
  0x69   :  { %3311 = vmatprep.subr.bf16.mxu0 %v3651_v15  ;;  %3335 = vmatprep.subr.bf16.mxu1 %v3659_v22  ;;  %v1747_v15 = vand.u32 4294901760, %v3878_v28  ;;  %v1759_v22 = vand.u32 4294901760, %v3883_v53 }
  0x6a   :  { %v3959_v21 = vsub.f32 %v101_v54, %v3910_v20  ;;  %3038 = vrot.lane.b32.xlu1 %v3921_v23, %s3583_s2  ;;  %v1249_v54 = vsub.f32 %v3931_v46, %v1248_v35 }
  0x6b   :  { %539 = vmatmul.mubr.f32.vlgmr.msra.gmra.mrb[0].mxu0 %v3694_v44  ;;  %1056 = vmatmul.mubr.f32.vlgmr.msra.gmra.mrb[0].mxu1 %v3694_v44  ;;  %v1748_v27 = vsub.f32 %v3878_v28, %v1747_v15  ;;  %v1760_v38 = vsub.f32 %v3883_v53, %v1759_v22 }
  0x6c   :  { %3313 = vmatpush1.bf16.msra.mxu0 %v3663_v24  ;;  %3337 = vmatpush1.bf16.msra.mxu1 %v3678_v36  ;;  %v1237_v24 = vsub.f32 %v3848_v30, %v1236_v19  ;;  %v1742_v36 = vsub.f32 %v3855_v33, %v1741_v49  ;;  %v1771_v59 = vand.u32 4294901760, %v3959_v21 }
  0x6d   :  { %554 = vmatprep.subr.mxu0 %v3673_v32  ;;  %1071 = vmatprep.subr.mxu1 %v3684_v39  ;;  %v1754_v32 = vsub.f32 %v3862_v50, %v1753_v3  ;;  %v1231_v39 = vsub.f32 %v3867_v8, %v1230_v5  ;;  %v1749_v47 = vand.u32 4294901760, %v1748_v27  ;;  %v1761_v9 = vand.u32 4294901760, %v1760_v38 }
  0x6e   :  { %615 = vmatprep.mubr.f32.mxu0 %v3582_v0  ;;  %1132 = vmatprep.mubr.f32.mxu1 %v3582_v0  ;;  %v1743_v7 = vand.u32 4294901760, %v1742_v36  ;;  %v1772_v27 = vsub.f32 %v3959_v21, %v1771_v59  ;;  %v1250_v38 = vand.u32 4294901760, %v1249_v54 }
  0x6f   :  { %v1755_v16 = vand.u32 4294901760, %v1754_v32  ;;  %v1232_v51 = vand.u32 4294901760, %v1231_v39  ;;  %v3368_v39 = vpack.c.bf16 %v1761_v9, %v1749_v47  ;;  %3049 = vrot.lane.b32.xlu1 %v3019_v43, %s3584_s22  ;;  %3047 = vrot.lane.b32.xlu0 %v3844_v26, %s3584_s22  ;;  %v3346_v26 = vpack.c.bf16 %v3848_v30, %v3846_v29 }
  0x70   :  { %556 = vmatpush1.msra.mxu0 %v3687_v40  ;;  %1073 = vmatpush1.msra.mxu1 %v3689_v41  ;;  %v1226_v40 = vand.u32 4294901760, %v1225_v10  ;;  %v1238_v41 = vand.u32 4294901760, %v1237_v24  ;;  %v1766_v10 = vsub.f32 %v3934_v11, %v1765_v42  ;;  %v3370_v43 = vpack.c.bf16 %v3862_v50, %v3855_v33 }
  0x71   :  { %3339 = vmatprep.subr.bf16.mxu0 %v3895_v56  ;;  %3363 = vmatprep.subr.bf16.mxu1 %v3905_v2  ;;  %v3366_v36 = vpack.c.bf16 %v1755_v16, %v1743_v7  ;;  %v3344_v32 = vpack.c.bf16 %v1244_v37, %v1232_v51  ;;  %v1773_v7 = vand.u32 4294901760, %v1772_v27  ;;  %v3372_v16 = vpack.c.bf16 %v3883_v53, %v3878_v28 }
  0x72   :  { %v3342_v24 = vpack.c.bf16 %v1238_v41, %v1226_v40  ;;  %v1767_v40 = vand.u32 4294901760, %v1766_v10  ;;  %v1256_v41 = vand.u32 4294901760, %v1255_v25  ;;  %v3380_v29 = vpack.c.bf16 %v1759_v22, %v1747_v15 }
  0x73   :  { %617 = vmatmul.mubr.f32.vlgmr.msra.gmra.mrb[0].mxu0 %v3694_v44  ;;  %1134 = vmatmul.mubr.f32.vlgmr.msra.gmra.mrb[0].mxu1 %v3694_v44  ;;  %v3586_v37 = vmov 2475754826   ;;  %v3587_v9 = vmov 2131351028   ;;  %v3589_v10 = vmov 920167782  }
  0x74   :  { %3341 = vmatpush1.bf16.msra.mxu0 %v3976_v31  ;;  %3365 = vmatpush1.bf16.msra.mxu1 %v3982_v34 }
  0x75   :  { %1149 = vmatprep.subr.mxu0 %v3897_v57  ;;  %1666 = vmatprep.subr.mxu1 %v3899_v63 }
  0x76   :  { %1210 = vmatprep.mubr.f32.mxu0 %v3582_v0  ;;  %1727 = vmatprep.mubr.f32.mxu1 %v3582_v0 }
  0x77   :  { %3053 = vrot.lane.b32.xlu1 %v3921_v23, %s3584_s22  ;;  %3051 = vrot.lane.b32.xlu0 %v3840_v4, %s3584_s22  ;;  %v3354_v4 = vpack.c.bf16 %v1236_v19, %v1224_v48  ;;  %v3378_v23 = vpack.c.bf16 %v1753_v3, %v1741_v49 }
  0x78   :  { %1151 = vmatpush1.msra.mxu0 %v3901_v1  ;;  %1668 = vmatpush1.msra.mxu1 %v3910_v20 }
  0x79   :  { %1216 = vmatmul.mubr.f32.vlgmr.msra.gmra.mrb[2].mxu0 %v3750_v13  ;;  %1733 = vmatmul.mubr.f32.vlgmr.msra.gmra.mrb[2].mxu1 %v3750_v13  ;;  %v3348_v13 = vpack.c.bf16 %v3872_v12, %v3867_v8 }
  0x7a   :  { %3343 = vmatprep.subr.bf16.mxu0 %v3342_v24  ;;  %3367 = vmatprep.subr.bf16.mxu1 %v3366_v36 }
  0x7b   :  { %3345 = vmatpush1.bf16.msra.mxu0 %v3344_v32  ;;  %3369 = vmatpush1.bf16.msra.mxu1 %v3368_v39 }
  0x7c   :  { %1251 = vmatprep.subr.mxu0 %v1250_v38  ;;  %1768 = vmatprep.subr.mxu1 %v1767_v40  ;;  %v3590_v38 = vmov 1326507024  }
  0x7d   :  { %1316 = vmatprep.mubr.f32.mxu0 %v3582_v0  ;;  %1833 = vmatprep.mubr.f32.mxu1 %v3582_v0 }
  0x7f   :  { %1257 = vmatpush1.msra.mxu0 %v1256_v41  ;;  %1774 = vmatpush1.msra.mxu1 %v1773_v7 }
  0x80   :  { %3347 = vmatprep.subr.bf16.mxu0 %v3346_v26  ;;  %3371 = vmatprep.subr.bf16.mxu1 %v3370_v43 }
  0x81   :  { %1318 = vmatmul.mubr.f32.vlgmr.msra.gmra.mrb[2].mxu0 %v3694_v44  ;;  %1835 = vmatmul.mubr.f32.vlgmr.msra.gmra.mrb[2].mxu1 %v3694_v44 }
  0x82   :  { %3349 = vmatpush1.bf16.msra.mxu0 %v3348_v13  ;;  %3373 = vmatpush1.bf16.msra.mxu1 %v3372_v16 }
  0x83   :  { %1338 = vmatprep.subr.mxu0 %v3931_v46  ;;  %1855 = vmatprep.subr.mxu1 %v3934_v11 }
  0x84   :  { %1400 = vmatprep.mubr.f32.mxu0 %v3582_v0  ;;  %1917 = vmatprep.mubr.f32.mxu1 %v3582_v0 }
  0x86   :  { %1341 = vmatpush1.msra.mxu0 %v3928_v45  ;;  %1858 = vmatpush1.msra.mxu1 %v3959_v21 }
  0x87   :  { %3351 = vmatprep.subr.bf16.mxu0 %v3895_v56  ;;  %3375 = vmatprep.subr.bf16.mxu1 %v3905_v2 }
  0x89   :  { %1403 = vmatmul.mubr.f32.vlgmr.msra.gmra.mrb[2].mxu0 %v3712_v52  ;;  %1920 = vmatmul.mubr.f32.vlgmr.msra.gmra.mrb[2].mxu1 %v3712_v52  ;;  %v3356_v52 = vpack.c.bf16 %v1242_v6, %v1230_v5 }
  0x8a   :  { %3353 = vmatpush1.bf16.msra.mxu0 %v3976_v31  ;;  %3377 = vmatpush1.bf16.msra.mxu1 %v3982_v34 }
  0x8b   :  { %1418 = vmatprep.subr.mxu0 %v3897_v57  ;;  %1935 = vmatprep.subr.mxu1 %v3899_v63 }
  0x8c   :  { %1479 = vmatprep.mubr.f32.mxu0 %v3582_v0  ;;  %1996 = vmatprep.mubr.f32.mxu1 %v3582_v0 }
  0x8e   :  { %1420 = vmatpush1.msra.mxu0 %v3901_v1  ;;  %1937 = vmatpush1.msra.mxu1 %v3910_v20 }
  0x8f   :  { %3355 = vmatprep.subr.bf16.mxu0 %v3354_v4  ;;  %3379 = vmatprep.subr.bf16.mxu1 %v3378_v23 }
  0x91   :  { %1483 = vmatmul.mubr.f32.vlgmr.msra.gmra.mrb[2].mxu0 %v3730_v60  ;;  %2000 = vmatmul.mubr.f32.vlgmr.msra.gmra.mrb[2].mxu1 %v3730_v60 }
  0x92   :  { %3357 = vmatpush1.bf16.msra.mxu0 %v3356_v52  ;;  %3381 = vmatpush1.bf16.msra.mxu1 %v3380_v29 }
  0x93   :  { %1508 = vmatprep.subr.mxu0 %v1248_v35  ;;  %2025 = vmatprep.subr.mxu1 %v1765_v42 }
  0x94   :  { %1571 = vmatprep.mubr.f32.mxu0 %v3582_v0  ;;  %2088 = vmatprep.mubr.f32.mxu1 %v3582_v0 }
  0x96   :  { %1512 = vmatpush1.msra.mxu0 %v1254_v58  ;;  %2029 = vmatpush1.msra.mxu1 %v1771_v59  ;;  %v3588_v59 = vmov 2102212464  }
  0x97   :  { %3359 = vmatprep.subr.bf16.mxu0 %v3895_v56  ;;  %3383 = vmatprep.subr.bf16.mxu1 %v3905_v2 }
  0x99   :  { %1573 = vmatmul.mubr.f32.vlgmr.msra.gmra.mrb[2].mxu0 %v3694_v44  ;;  %2090 = vmatmul.mubr.f32.vlgmr.msra.gmra.mrb[2].mxu1 %v3694_v44 }
  0x9a   :  { %3361 = vmatpush1.bf16.msra.mxu0 %v3976_v31  ;;  %3385 = vmatpush1.bf16.msra.mxu1 %v3982_v34  ;;  %v3585_v34 = vmov 683565275  }
  0x9b   :  { %1588 = vmatprep.subr.mxu0 %v3897_v57  ;;  %2105 = vmatprep.subr.mxu1 %v3899_v63 }
  0x9c   :  { %1649 = vmatprep.mubr.f32.mxu0 %v3582_v0  ;;  %2166 = vmatprep.mubr.f32.mxu1 %v3582_v0 }
  0x9e   :  { %1590 = vmatpush1.msra.mxu0 %v3901_v1  ;;  %2107 = vmatpush1.msra.mxu1 %v3910_v20 }
  0xa1   :  { %1651 = vmatmul.mubr.f32.vlgmr.msra.gmra.mrb[2].mxu0 %v3694_v44  ;;  %2168 = vmatmul.mubr.f32.vlgmr.msra.gmra.mrb[2].mxu1 %v3694_v44 }
 0x146   :  { %v4089_v60 = vpop.f32.mrb[0].mxu0  ;;  %v4091_v30 = vpop.f32.mrb[0].mxu1 }
 0x147   :  { %v2174_v33 = vand.u32 2147483647, %v4089_v60  ;;  %v2177_v50 = vand.u32 2139095040, %v4089_v60  ;;  %v2382_v8 = vand.u32 2147483647, %v4091_v30  ;;  %v2385_v0 = vand.u32 2139095040, %v4091_v30 }
 0x148   :  { %v4097_v12 = vpop.f32.mrb[1].mxu0  ;;  %v4099_v28 = vpop.f32.mrb[1].mxu1 }
 0x149   :  { %v2178_v53 = vshrl.u32 %v2177_v50, 23  ;;  %v2181_v44 = vand.u32 8388607, %v2174_v33  ;;  %v2386_v56 = vshrl.u32 %v2385_v0, 23  ;;  %v2389_v57 = vand.u32 8388607, %v2382_v8 }
 0x14a   :  { %v2281_v63 = vand.u32 2139095040, %v4097_v12 }
 0x14b   :  { %v3258_v1 = vadd.s32 4294967169, %v2178_v53  ;;  %v3266_v2 = vadd.s32 4294967169, %v2386_v56  ;;  %v2182_v49 = vor.u32 8388608, %v2181_v44  ;;  %v2390_v20 = vor.u32 8388608, %v2389_v57 }
 0x14c   :  { %v2282_v48 = vshrl.u32 %v2281_v63, 23 }
 0x14d   :  { %v2184_v19 = vadd.s32 1, %v3258_v1  ;;  %v2392_v3 = vadd.s32 1, %v3266_v2  ;;  %v4106_v46 = vshll.u32 %v2182_v49, 8  ;;  %v4108_v11 = vshll.u32 %v2390_v20, 8 }
 0x14e   :  { %v3262_v5 = vadd.s32 4294967169, %v2282_v48 }
 0x14f   :  { %vm2185_vm2 = vcmp.gt.s32.totalorder %v2184_v19, 0  ;;  %vm2393_vm3 = vcmp.gt.s32.totalorder %v2392_v3, 0 }
 0x150   :  { %v2186_v6 = vsel %vm2185_vm2, %v2184_v19, 0  ;;  %v2394_v45 = vsel %vm2393_vm3, %v2392_v3, 0  ;;  %v4110_v21 = vadd.s32 1, %v3262_v5 }
 0x151   :  { %v2187_v15 = vshrl.u32 %v2186_v6, 5  ;;  %v2188_v22 = vand.u32 31, %v2186_v6  ;;  %v4113_v42 = vshrl.u32 %v2394_v45, 5  ;;  %v2396_v51 = vand.u32 31, %v2394_v45 }
 0x152   :  { %vm2289_vm8 = vcmp.gt.s32.totalorder %v4110_v21, 0 }
 0x153   :  { %v2189_v31 = vsub.s32 32, %v2188_v22  ;;  %v2191_v35 = vshll.u32 %v3585_v34, %v2188_v22  ;;  %v2194_v47 = vshll.u32 %v3586_v37, %v2188_v22  ;;  %v2197_v58 = vshll.u32 %v3587_v9, %v2188_v22 }
 0x154   :  { %v2200_v54 = vshll.u32 %v3588_v59, %v2188_v22  ;;  %v2203_v24 = vshll.u32 %v3589_v10, %v2188_v22  ;;  %vm2206_vm4 = vcmp.lt.s32.totalorder %v2187_v15, 1  ;;  %vm2207_vm5 = vcmp.lt.s32.totalorder %v2187_v15, 2 }
 0x155   :  { %v2192_v36 = vshrl.u32 %v3586_v37, %v2189_v31  ;;  %v2195_v32 = vshrl.u32 %v3587_v9, %v2189_v31  ;;  %v2198_v39 = vshrl.u32 %v3588_v59, %v2189_v31  ;;  %v2190_v25 = vshrl.u32 %v3585_v34, %v2189_v31 }
 0x156   :  { %v2201_v27 = vshrl.u32 %v3589_v10, %v2189_v31  ;;  %v2204_v40 = vshrl.u32 %v3590_v38, %v2189_v31  ;;  %v2397_v43 = vsub.s32 32, %v2396_v51  ;;  %vm2208_vm6 = vcmp.lt.s32.totalorder %v2187_v15, 3 }
 0x157   :  { %v2193_v41 = vor.u32 %v2192_v36, %v2191_v35  ;;  %v2196_v7 = vor.u32 %v2195_v32, %v2194_v47  ;;  %v2199_v26 = vor.u32 %v2198_v39, %v2197_v58  ;;  %vm2209_vm7 = vcmp.lt.s32.totalorder %v2187_v15, 4 }
 0x158   :  { %v2202_v13 = vor.u32 %v2201_v27, %v2200_v54  ;;  %v2205_v16 = vor.u32 %v2204_v40, %v2203_v24  ;;  %v2399_v44 = vshll.u32 %v3585_v34, %v2396_v51  ;;  %v2400_v63 = vshrl.u32 %v3586_v37, %v2397_v43 }
 0x159   :  { %v2210_v4 = vsel %vm2206_vm4, %v2190_v25, %v2193_v41  ;;  %v2211_v23 = vsel %vm2209_vm7, %v2199_v26, 2102212464  ;;  %v2214_v52 = vsel %vm2206_vm4, %v2193_v41, %v2196_v7  ;;  %v2218_v29 = vsel %vm2206_vm4, %v2196_v7, %v2199_v26 }
 0x15a   :  { %v2212_v50 = vsel %vm2208_vm6, %v2196_v7, %v2211_v23  ;;  %v2215_v0 = vsel %vm2209_vm7, %v2202_v13, 920167782  ;;  %v2219_v53 = vsel %vm2209_vm7, %v2205_v16, 1326507024  ;;  %v2402_v1 = vshll.u32 %v3586_v37, %v2396_v51 }
 0x15b   :  { %v2216_v56 = vsel %vm2208_vm6, %v2199_v26, %v2215_v0  ;;  %v2220_v57 = vsel %vm2208_vm6, %v2202_v13, %v2219_v53  ;;  %v2213_v2 = vsel %vm2207_vm5, %v2210_v4, %v2212_v50  ;;  %v2403_v49 = vshrl.u32 %v3587_v9, %v2397_v43 }
 0x15c   :  { %v2217_v48 = vsel %vm2207_vm5, %v2214_v52, %v2216_v56  ;;  %v2221_v19 = vsel %vm2207_vm5, %v2218_v29, %v2220_v57  ;;  %v2401_v22 = vor.u32 %v2400_v63, %v2399_v44  ;;  %v2405_v31 = vshll.u32 %v3587_v9, %v2396_v51 }
 0x15d   :  { %v4137_v20 = vmul.u32.u64.low %v4106_v46, %v2221_v19  ;;  %v4138_v3 = vmul.u32.u64.high %v4106_v46, %v2221_v19, %v4137_v20  ;;  %v4141_v5 = vmul.u32.u64.low %v4106_v46, %v2217_v48  ;;  %v4142_v6 = vmul.u32.u64.high %v4106_v46, %v2217_v48, %v4141_v5 }
 0x15e   :  { %v2404_v45 = vor.u32 %v2403_v49, %v2402_v1  ;;  %v2406_v35 = vshrl.u32 %v3588_v59, %v2397_v43  ;;  %v2398_v15 = vshrl.u32 %v3585_v34, %v2397_v43  ;;  %v2408_v47 = vshll.u32 %v3588_v59, %v2396_v51 }
 0x15f   :  { %v2409_v58 = vshrl.u32 %v3589_v10, %v2397_v43  ;;  %v2412_v54 = vshrl.u32 %v3590_v38, %v2397_v43  ;;  %v2229_v24 = vmul.u32 %v4106_v46, %v2213_v2  ;;  %v2411_v32 = vshll.u32 %v3589_v10, %v2396_v51 }
 0x160   :  { %v2407_v36 = vor.u32 %v2406_v35, %v2405_v31  ;;  %vm2414_vm9 = vcmp.lt.s32.totalorder %v4113_v42, 1  ;;  %vm2231_vm10 = vc.u32 %v4138_v3, %v4141_v5  ;;  %v2232_v39 = vadd.s32 1, %v4142_v6 }
 0x161   :  { %v2410_v25 = vor.u32 %v2409_v58, %v2408_v47  ;;  %vm2415_vm11 = vcmp.lt.s32.totalorder %v4113_v42, 2  ;;  %v2413_v27 = vor.u32 %v2412_v54, %v2411_v32  ;;  %vm2416_vm12 = vcmp.lt.s32.totalorder %v4113_v42, 3 }
 0x162   :  { %vm2417_vm13 = vcmp.lt.s32.totalorder %v4113_v42, 4  ;;  %v2422_v40 = vsel %vm2414_vm9, %v2401_v22, %v2404_v45  ;;  %v2233_v46 = vsel %vm2231_vm10, %v2232_v39, %v4142_v6  ;;  %v2426_v7 = vsel %vm2414_vm9, %v2404_v45, %v2407_v36 }
 0x163   :  { %v2419_v41 = vsel %vm2417_vm13, %v2407_v36, 2102212464  ;;  %v2423_v51 = vsel %vm2417_vm13, %v2410_v25, 920167782  ;;  %v2234_v26 = vadd.s32 %v2233_v46, %v2229_v24  ;;  %v2418_v43 = vsel %vm2414_vm9, %v2398_v15, %v2401_v22 }
 0x164   :  { %v2424_v13 = vsel %vm2416_vm12, %v2407_v36, %v2423_v51  ;;  %v2427_v16 = vsel %vm2417_vm13, %v2413_v27, 1326507024  ;;  %v2420_v4 = vsel %vm2416_vm12, %v2404_v45, %v2419_v41  ;;  %v2290_v29 = vsel %vm2289_vm8, %v4110_v21, 0 }
 0x165   :  { %v2425_v23 = vsel %vm2415_vm11, %v2422_v40, %v2424_v13  ;;  %v2428_v52 = vsel %vm2416_vm12, %v2410_v25, %v2427_v16  ;;  %v2235_v50 = vadd.s32 536870912, %v2234_v26  ;;  %v2421_v1 = vsel %vm2415_vm11, %v2418_v43, %v2420_v4 }
 0x166   :  { %v2429_v0 = vsel %vm2415_vm11, %v2426_v7, %v2428_v52  ;;  %v4169_v53 = vmul.u32.u64.low %v4108_v11, %v2425_v23  ;;  %v4170_v44 = vmul.u32.u64.high %v4108_v11, %v2425_v23, %v4169_v53  ;;  %v2278_v21 = vand.u32 2147483647, %v4097_v12 }
 0x167   :  { %v4174_v56 = vmul.u32.u64.low %v4108_v11, %v2429_v0  ;;  %v4175_v57 = vmul.u32.u64.high %v4108_v11, %v2429_v0, %v4174_v56  ;;  %v4177_v63 = vshrl.u32 %v2235_v50, 30  ;;  %v2292_v2 = vand.u32 31, %v2290_v29 }
 0x168   :  { %v2440_v19 = vadd.s32 1, %v4170_v44  ;;  %v2489_v20 = vand.u32 2139095040, %v4099_v28  ;;  %v2437_v6 = vmul.u32 %v4108_v11, %v2421_v1  ;;  %v2285_v45 = vand.u32 8388607, %v2278_v21 }
 0x169   :  { %v2237_v48 = vshll.u32 %v4177_v63, 30  ;;  %v2293_v49 = vsub.s32 32, %v2292_v2  ;;  %vm2439_vm14 = vc.u32 %v4175_v57, %v4169_v53  ;;  %v2295_v35 = vshll.u32 %v3585_v34, %v2292_v2 }
 0x16a   :  { %v2441_v42 = vsel %vm2439_vm14, %v2440_v19, %v4170_v44  ;;  %v2291_v11 = vshrl.u32 %v2290_v29, 5  ;;  %v2298_v54 = vshll.u32 %v3586_v37, %v2292_v2  ;;  %v2490_v24 = vshrl.u32 %v2489_v20, 23 }
 0x16b   :  { %v4188_v22 = vsub.s32 %v2234_v26, %v2237_v48  ;;  %v2442_v31 = vadd.s32 %v2441_v42, %v2437_v6  ;;  %v2296_v15 = vshrl.u32 %v3586_v37, %v2293_v49  ;;  %v2299_v47 = vshrl.u32 %v3587_v9, %v2293_v49 }
 0x16c   :  { %v2301_v39 = vshll.u32 %v3587_v9, %v2292_v2  ;;  %v2302_v25 = vshrl.u32 %v3588_v59, %v2293_v49  ;;  %v2304_v46 = vshll.u32 %v3588_v59, %v2292_v2  ;;  %v2305_v41 = vshrl.u32 %v3589_v10, %v2293_v49 }
 0x16d   :  { %v2240_v58 = vsub.s32 0, %v4188_v22  ;;  %v2443_v36 = vadd.s32 536870912, %v2442_v31  ;;  %v2297_v32 = vor.u32 %v2296_v15, %v2295_v35  ;;  %v2300_v40 = vor.u32 %v2299_v47, %v2298_v54 }
 0x16e   :  { %v2303_v7 = vor.u32 %v2302_v25, %v2301_v39  ;;  %v2307_v26 = vshll.u32 %v3589_v10, %v2292_v2  ;;  %v2308_v43 = vshrl.u32 %v3590_v38, %v2293_v49  ;;  %v2286_v16 = vor.u32 8388608, %v2285_v45 }
 0x16f   :  { %v3259_v27 = vmin.u32 %v2240_v58, %v4188_v22  ;;  %v4203_v51 = vshrl.u32 %v2443_v36, 30  ;;  %v2306_v4 = vor.u32 %v2305_v41, %v2304_v46  ;;  %vm2310_vm15 = vcmp.lt.s32.totalorder %v2291_v11, 1 }
 0x170   :  { %v2309_v52 = vor.u32 %v2308_v43, %v2307_v26  ;;  %vm2313_vm0 = vcmp.lt.s32.totalorder %v2291_v11, 4  ;;  %vm2312_vm1 = vcmp.lt.s32.totalorder %v2291_v11, 3  ;;  %v2318_v1 = vsel %vm2310_vm15, %v2297_v32, %v2300_v40 }
 0x171   :  { %v2242_v13 = vclz %v3259_v27  ;;  %v2445_v23 = vshll.u32 %v4203_v51, 30  ;;  %v2319_v50 = vsel %vm2313_vm0, %v2306_v4, 920167782  ;;  %v3270_v48 = vadd.s32 4294967169, %v2490_v24 }
 0x172   :  { %v2320_v2 = vsel %vm2312_vm1, %v2303_v7, %v2319_v50  ;;  %v2315_v6 = vsel %vm2313_vm0, %v2303_v7, 2102212464  ;;  %v2322_v42 = vsel %vm2310_vm15, %v2300_v40, %v2303_v7  ;;  %v2323_v45 = vsel %vm2313_vm0, %v2309_v52, 1326507024 }
 0x173   :  { %v3260_v29 = vadd.s32 4294967294, %v2242_v13  ;;  %v4212_v56 = vsub.s32 %v2442_v31, %v2445_v23  ;;  %v2294_v31 = vshrl.u32 %v3585_v34, %v2293_v49  ;;  %vm2311_vm3 = vcmp.lt.s32.totalorder %v2291_v11, 2 }
 0x174   :  { %v4208_v0 = vpop.f32.mrb[2].mxu0  ;;  %v4210_v44 = vpop.f32.mrb[2].mxu1  ;;  %v2321_v58 = vsel %vm2311_vm3, %v2318_v1, %v2320_v2  ;;  %v2324_v54 = vsel %vm2312_vm1, %v2306_v4, %v2323_v45  ;;  %v2326_v24 = vshll.u32 %v2286_v16, 8  ;;  %v2316_v25 = vsel %vm2312_vm1, %v2300_v40, %v2315_v6 }
 0x175   :  { %v4216_v19 = vpop.f32.mrb[3].mxu0  ;;  %v4218_v20 = vpop.f32.mrb[3].mxu1  ;;  %vm3261_vm2 = vcmp.lt.s32.totalorder %v3260_v29, 0  ;;  %v2448_v15 = vsub.s32 0, %v4212_v56  ;;  %v2314_v39 = vsel %vm2310_vm15, %v2294_v31, %v2297_v32  ;;  %v2325_v27 = vsel %vm2311_vm3, %v2322_v42, %v2324_v54 }
 0x176   :  { %v2245_v35 = vsel %vm3261_vm2, 0, %v3260_v29  ;;  %v4229_v7 = vmul.u32.u64.low %v2326_v24, %v2325_v27  ;;  %v4230_v26 = vmul.u32.u64.high %v2326_v24, %v2325_v27, %v4229_v7  ;;  %v2496_v4 = vadd.s32 1, %v3270_v48 }
 0x177   :  { %v2250_v47 = vsub.s32 4294967266, %v2245_v35  ;;  %v3267_v36 = vmin.u32 %v2448_v15, %v4212_v56  ;;  %v2246_v46 = vsub.s32 32, %v2245_v35  ;;  %v2230_v16 = vadd.s32 %v4141_v5, %v4138_v3 }
 0x178   :  { %v4232_v43 = vmul.u32.u64.low %v2326_v24, %v2321_v58  ;;  %v4233_v13 = vmul.u32.u64.high %v2326_v24, %v2321_v58, %v4232_v43  ;;  %v2317_v40 = vsel %vm2311_vm3, %v2314_v39, %v2316_v25  ;;  %vm2497_vm4 = vcmp.gt.s32.totalorder %v2496_v4, 0 }
 0x179   :  { %v2251_v41 = vadd.s32 127, %v2250_v47  ;;  %v2450_v49 = vclz %v3267_v36  ;;  %v2248_v52 = vshrl.u32 %v2230_v16, %v2246_v46  ;;  %v2486_v50 = vand.u32 2147483647, %v4099_v28 }
 0x17a   :  { %vm2335_vm5 = vc.u32 %v4230_v26, %v4232_v43  ;;  %v2336_v29 = vadd.s32 1, %v4233_v13  ;;  %v2498_v1 = vsel %vm2497_vm4, %v2496_v4, 0  ;;  %v2333_v2 = vmul.u32 %v2326_v24, %v2317_v40 }
 0x17b   :  { %v2252_v23 = vshll.u32 %v2251_v41, 23  ;;  %v3268_v32 = vadd.s32 4294967294, %v2450_v49  ;;  %v2500_v6 = vand.u32 31, %v2498_v1  ;;  %v2247_v48 = vshll.u32 %v4188_v22, %v2245_v35 }
 0x17c   :  { %v2337_v3 = vsel %vm2335_vm5, %v2336_v29, %v4233_v13  ;;  %v2493_v15 = vand.u32 8388607, %v2486_v50  ;;  %v2499_v41 = vshrl.u32 %v2498_v1, 5  ;;  %vm2176_vm11 = vcmp.lt.s32.totalorder %v4089_v60, 0 }
 0x17d   :  { %v2253_v42 = vor.u32 4788187, %v2252_v23  ;;  %vm3269_vm6 = vcmp.lt.s32.totalorder %v3268_v32, 0  ;;  %v2338_v5 = vadd.s32 %v2337_v3, %v2333_v2  ;;  %v2501_v11 = vsub.s32 32, %v2500_v6 }
 0x17e   :  { %v2249_v45 = vor.u32 %v2248_v52, %v2247_v48  ;;  %v4247_v31 = vsel %vm3269_vm6, 0, %v3268_v32  ;;  %v2494_v25 = vor.u32 8388608, %v2493_v15  ;;  %v2503_v27 = vshll.u32 %v3585_v34, %v2500_v6 }
 0x17f   :  { %v2339_v47 = vadd.s32 536870912, %v2338_v5  ;;  %v2254_v58 = vand.u32 2147483647, %v2253_v42  ;;  %v2504_v54 = vshrl.u32 %v3586_v37, %v2501_v11  ;;  %v2507_v22 = vshrl.u32 %v3587_v9, %v2501_v11 }
 0x180   :  { %v2510_v35 = vshrl.u32 %v3588_v59, %v2501_v11  ;;  %v2256_v36 = vcvt.s32.f32 %v2249_v45  ;;  %v2458_v39 = vsub.s32 4294967266, %v4247_v31  ;;  %v2506_v7 = vshll.u32 %v3586_v37, %v2500_v6 }
 0x181   :  { %v4250_v24 = vshrl.u32 %v2339_v47, 30  ;;  %v2509_v49 = vshll.u32 %v3587_v9, %v2500_v6  ;;  %v2505_v4 = vor.u32 %v2504_v54, %v2503_v27  ;;  %v2512_v16 = vshll.u32 %v3588_v59, %v2500_v6 }
 0x182   :  { %v2257_v13 = vmul.f32 %v2256_v36, %v2254_v58  ;;  %v2513_v23 = vshrl.u32 %v3589_v10, %v2501_v11  ;;  %v2508_v40 = vor.u32 %v2507_v22, %v2506_v7  ;;  %v2516_v29 = vshrl.u32 %v3590_v38, %v2501_v11 }
 0x183   :  { %v2341_v46 = vshll.u32 %v4250_v24, 30  ;;  %v2511_v52 = vor.u32 %v2510_v35, %v2509_v49  ;;  %v2459_v2 = vadd.s32 127, %v2458_v39  ;;  %v2515_v1 = vshll.u32 %v3589_v10, %v2500_v6  ;;  %v4275_v39 = vpop.permute.xlu1 %3036 }
 0x184   :  { %v2514_v48 = vor.u32 %v2513_v23, %v2512_v16  ;;  %v2438_v37 = vadd.s32 %v4169_v53, %v4175_v57  ;;  %v2534_v42 = vshll.u32 %v2494_v25, 8  ;;  %v2454_v59 = vsub.s32 32, %v4247_v31 }
 0x185   :  { %v4261_v32 = vsub.s32 %v2338_v5, %v2341_v46  ;;  %v2517_v3 = vor.u32 %v2516_v29, %v2515_v1  ;;  %vm2518_vm7 = vcmp.lt.s32.totalorder %v2499_v41, 1  ;;  %vm2521_vm8 = vcmp.lt.s32.totalorder %v2499_v41, 4  ;;  %v4299_v1 = vpop.permute.xlu0 %3032 }
 0x186   :  { %v2258_v5 = vxor.u32 2147483648, %v2257_v13  ;;  %v2523_v38 = vsel %vm2521_vm8, %v2511_v52, 2102212464  ;;  %v2526_v15 = vsel %vm2518_vm7, %v2505_v4, %v2508_v40  ;;  %v2460_v47 = vshll.u32 %v2459_v2, 23 }
 0x187   :  { %v2344_v9 = vsub.s32 0, %v4261_v32  ;;  %v2502_v10 = vshrl.u32 %v3585_v34, %v2501_v11  ;;  %vm2520_vm9 = vcmp.lt.s32.totalorder %v2499_v41, 3  ;;  %v2527_v53 = vsel %vm2521_vm8, %v2514_v48, 920167782 }
 0x188   :  { %vm2519_vm10 = vcmp.lt.s32.totalorder %v2499_v41, 2  ;;  %v2528_v6 = vsel %vm2520_vm9, %v2511_v52, %v2527_v53  ;;  %v2530_v58 = vsel %vm2518_vm7, %v2508_v40, %v2511_v52  ;;  %v2524_v22 = vsel %vm2520_vm9, %v2508_v40, %v2523_v38 }
 0x189   :  { %v3263_v45 = vmin.u32 %v2344_v9, %v4261_v32  ;;  %v2522_v54 = vsel %vm2518_vm7, %v2502_v10, %v2505_v4  ;;  %v2529_v35 = vsel %vm2519_vm10, %v2526_v15, %v2528_v6  ;;  %v2531_v36 = vsel %vm2521_vm8, %v2517_v3, 1326507024 }
 0x18a   :  { %v2456_v25 = vshrl.u32 %v2438_v37, %v2454_v59  ;;  %v2532_v34 = vsel %vm2520_vm9, %v2514_v48, %v2531_v36  ;;  %v2259_v11 = vsel %vm2176_vm11, %v2258_v5, %v2257_v13  ;;  %v2525_v4 = vsel %vm2519_vm10, %v2522_v54, %v2524_v22  ;;  %v4305_v59 = vpop.permute.xlu1 %3038 }
 0x18b   :  { %v2346_v57 = vclz %v3263_v45  ;;  %v2533_v46 = vsel %vm2519_vm10, %v2530_v58, %v2532_v34  ;;  %v4281_v7 = vmul.u32.u64.low %v2534_v42, %v2529_v35  ;;  %v4282_v49 = vmul.u32.u64.high %v2534_v42, %v2529_v35, %v4281_v7 }
 0x18c   :  { %v4286_v16 = vmul.u32.u64.low %v2534_v42, %v2533_v46  ;;  %v4287_v23 = vmul.u32.u64.high %v2534_v42, %v2533_v46, %v4286_v16  ;;  %v2455_v40 = vshll.u32 %v4212_v56, %v4247_v31  ;;  %v2461_v52 = vor.u32 4788187, %v2460_v47 }
 0x18d   :  { %v3264_v27 = vadd.s32 4294967294, %v2346_v57  ;;  %vm4293_vm13 = vcmp.le.f32.partialorder %v2174_v33, 0.7853982  ;;  %v2334_v2 = vadd.s32 %v4232_v43, %v4230_v26  ;;  %v2541_v31 = vmul.u32 %v2534_v42, %v2525_v4  ;;  %v3035_v57 = vpop.permute.xlu0 %3034 }
 0x18e   :  { %v2262_v37 = vsel %vm4293_vm13, %v4089_v60, %v2259_v11  ;;  %v2457_v56 = vor.u32 %v2456_v25, %v2455_v40  ;;  %v2544_v9 = vadd.s32 1, %v4282_v49  ;;  %vm2543_vm14 = vc.u32 %v4287_v23, %v4281_v7  ;;  %v4319_v22 = vpop.permute.xlu1 %3049 }
 0x18f   :  { %vm3265_vm12 = vcmp.lt.s32.totalorder %v3264_v27, 0  ;;  %v2260_v26 = vsub.s32 4, %v4177_v63  ;;  %v2462_v43 = vand.u32 2147483647, %v2461_v52  ;;  %v4313_v38 = vand.u32 127, %v3012_v61 }
 0x190   :  { %v2349_v29 = vsel %vm3265_vm12, 0, %v3264_v27  ;;  %v2545_v45 = vsel %vm2543_vm14, %v2544_v9, %v4282_v49  ;;  %3458 = vcosq.f32 %v2262_v37  ;;  %v2464_v10 = vcvt.s32.f32 %v2457_v56 }
 0x191   :  { %v2350_v48 = vsub.s32 32, %v2349_v29  ;;  %v2354_v41 = vsub.s32 4294967266, %v2349_v29  ;;  %v2351_v33 = vshll.u32 %v4261_v32, %v2349_v29  ;;  %v2546_v47 = vadd.s32 %v2545_v45, %v2541_v31 }
 0x192   :  { %3460 = vsinq.f32 %v2262_v37  ;;  %v2261_v6 = vsel %vm2176_vm11, %v2260_v26, %v4177_v63  ;;  %v2465_v58 = vmul.f32 %v2464_v10, %v2462_v43  ;;  %v2364_v54 = vsub.s32 4, %v4250_v24  ;;  %v4353_v31 = vpop.permute.xlu1 %3053 }
 0x193   :  { %v2352_v3 = vshrl.u32 %v2334_v2, %v2350_v48  ;;  %v2355_v5 = vadd.s32 127, %v2354_v41  ;;  %v2547_v53 = vadd.s32 536870912, %v2546_v47  ;;  %v3060_v35 = vadd.s32 128, %v4313_v38  ;;  %v3048_v41 = vpop.permute.xlu0 %3047 }
 0x194   :  { %v3591_v36 = vmov 1966171168   ;;  %vm3042_vm15 = vcmp.lt.s32.totalorder %v4313_v38, 127  ;;  %vm3055_vm0 = vcmp.lt.s32.totalorder %v4313_v38, 1  ;;  %v2263_v63 = vsel %vm4293_vm13, 0, %v2261_v6 }
 0x195   :  { %v2353_v42 = vor.u32 %v2352_v3, %v2351_v33  ;;  %v2356_v15 = vshll.u32 %v2355_v5, 23  ;;  %v3126_v25 = vunpack.c.l.s4 %v3591_v36  ;;  %v4322_v11 = vshrl.u32 %v2547_v53, 30 }
 0x196   :  { %vm2280_vm1 = vcmp.lt.s32.totalorder %v4097_v12, 0  ;;  %v2466_v4 = vxor.u32 2147483648, %v2465_v58  ;;  %v3074_v40 = vand.u32 1, %v3060_v35  ;;  %v3067_v52 = vand.u32 1, %v4313_v38 }
 0x197   :  { %v2357_v32 = vor.u32 4788187, %v2356_v15  ;;  %v2360_v34 = vcvt.s32.f32 %v2353_v42  ;;  %v2549_v49 = vshll.u32 %v4322_v11, 30  ;;  %v2365_v16 = vsel %vm2280_vm1, %v2364_v54, %v4250_v24 }
 0x198   :  { %v3127_v29 = vunpack.c.0.s8 %v3126_v25  ;;  %v4339_v13 = vsel %vm3042_vm15, %v3035_v57, %v4275_v39  ;;  %v2267_v37 = vadd.s32 3, %v2263_v63  ;;  %vm2279_vm2 = vcmp.le.f32.partialorder %v2278_v21, 0.7853982 }
 0x199   :  { %v2358_v27 = vand.u32 2147483647, %v2357_v32  ;;  %v4334_v48 = vsub.s32 %v2546_v47, %v2549_v49  ;;  %v4346_v24 = vsel %vm3042_vm15, %v4299_v1, %v3035_v57  ;;  %v4351_v56 = vsel %vm3055_vm0, %v3048_v41, %v4319_v22 }
 0x19a   :  { %v3459_v9 = vpop.eup %3458  ;;  %vm2384_vm3 = vcmp.lt.s32.totalorder %v4091_v30, 0  ;;  %v2367_v3 = vsel %vm2279_vm2, 0, %v2365_v16  ;;  %vm4362_vm4 = vcmp.eq.s32.totalorder %v3074_v40, 0  ;;  %vm4366_vm5 = vcmp.eq.s32.totalorder %v3067_v52, 0 }
 0x19b   :  { %v2361_v46 = vmul.f32 %v2360_v34, %v2358_v27  ;;  %v2552_v21 = vsub.s32 0, %v4334_v48  ;;  %v2467_v26 = vsel %vm2384_vm3, %v2466_v4, %v2465_v58  ;;  %v2468_v15 = vsub.s32 4, %v4203_v51 }
 0x19c   :  { %v3461_v5 = vpop.eup %3460  ;;  %v4375_v10 = vsel %vm3055_vm0, %v4353_v31, %v3048_v41  ;;  %v2268_v32 = vand.u32 3, %v2267_v37  ;;  %vm4379_vm6 = vcmp.le.f32.partialorder %v2382_v8, 0.7853982  ;;  %v2371_v57 = vadd.s32 3, %v2367_v3 }
 0x19d   :  { %v2362_v2 = vxor.u32 2147483648, %v2361_v46  ;;  %v3271_v47 = vmin.u32 %v2552_v21, %v4334_v48  ;;  %v2470_v6 = vsel %vm4379_vm6, %v4091_v30, %v2467_v26  ;;  %v2271_v54 = vxor.u32 2147483648, %v3461_v5 }
 0x19e   :  { %v2274_v35 = vxor.u32 2147483648, %v3459_v9  ;;  %v4387_v36 = vsub.s32 %v3127_v29, %v3793_v62  ;;  %v2683_v25 = vand.u32 3, %v2263_v63  ;;  %v3116_v8 = vsel %vm4362_vm4, %v4339_v13, %v4351_v56 }
 0x19f   :  { %v2363_v33 = vsel %vm2280_vm1, %v2362_v2, %v2361_v46  ;;  %v2554_v58 = vclz %v3271_v47  ;;  %v3115_v27 = vsel %vm4366_vm5, %v4346_v24, %v4375_v10  ;;  %v2469_v34 = vsel %vm2384_vm3, %v2468_v15, %v4203_v51 }
 0x1a0   :  { %v2366_v43 = vsel %vm2279_vm2, %v4097_v12, %v2363_v33  ;;  %v2786_v46 = vand.u32 3, %v2367_v3  ;;  %vm2266_vm7 = vweird.f32 %v4089_v60  ;;  %v2372_v63 = vand.u32 3, %v2371_v57 }
 0x1a1   :  { %3462 = vcosq.f32 %v2366_v43  ;;  %v3272_v49 = vadd.s32 4294967294, %v2554_v58  ;;  %vm2270_vm8 = vcmp.eq.s32.totalorder %v2268_v32, 0  ;;  %vm2273_vm9 = vcmp.eq.s32.totalorder %v2268_v32, 2 }
 0x1a2   :  { %3464 = vsinq.f32 %v2366_v43  ;;  %v2542_v4 = vadd.s32 %v4281_v7, %v4287_v23  ;;  %v2272_v16 = vsel %vm2270_vm8, %v3459_v9, %v2271_v54  ;;  %v2275_v40 = vsel %vm2273_vm9, %v2274_v35, %v3461_v5 }
 0x1a3   :  { %3466 = vcosq.f32 %v2470_v6  ;;  %vm3273_vm10 = vcmp.lt.s32.totalorder %v3272_v49, 0  ;;  %vm2370_vm11 = vweird.f32 %v4097_v12  ;;  %vm2269_vm12 = vcmp.lt.s32.totalorder %v2268_v32, 2 }
 0x1a4   :  { %v2557_v52 = vsel %vm3273_vm10, 0, %v3272_v49  ;;  %vm2685_vm13 = vcmp.eq.s32.totalorder %v2683_v25, 0  ;;  %vm2688_vm14 = vcmp.eq.s32.totalorder %v2683_v25, 2  ;;  %3468 = vsinq.f32 %v2470_v6 }
 0x1a5   :  { %v2558_v51 = vsub.s32 32, %v2557_v52  ;;  %v2562_v29 = vsub.s32 4294967266, %v2557_v52  ;;  %v2687_v2 = vsel %vm2685_vm13, %v3459_v9, %v2271_v54  ;;  %v2690_v13 = vsel %vm2688_vm14, %v2274_v35, %v3461_v5 }
 0x1a6   :  { %vm2373_vm1 = vcmp.lt.s32.totalorder %v2372_v63, 2  ;;  %vm2374_vm2 = vcmp.eq.s32.totalorder %v2372_v63, 0  ;;  %v2276_v41 = vsel %vm2269_vm12, %v2272_v16, %v2275_v40  ;;  %v2559_v7 = vshll.u32 %v4334_v48, %v2557_v52 }
 0x1a7   :  { %v2560_v23 = vshrl.u32 %v2542_v4, %v2558_v51  ;;  %v2563_v24 = vadd.s32 127, %v2562_v29  ;;  %vm2684_vm3 = vcmp.lt.s32.totalorder %v2683_v25, 2  ;;  %vm2377_vm4 = vcmp.eq.s32.totalorder %v2372_v63, 2 }
 0x1a8   :  { %vm2791_vm5 = vcmp.eq.s32.totalorder %v2786_v46, 2  ;;  %v2691_v3 = vsel %vm2684_vm3, %v2687_v2, %v2690_v13  ;;  %v2277_v9 = vsel %vm2266_vm7, nan, %v2276_v41  ;;  %vm2787_vm8 = vcmp.lt.s32.totalorder %v2786_v46, 2 }
 0x1a9   :  { %v2561_v21 = vor.u32 %v2560_v23, %v2559_v7  ;;  %v2564_v26 = vshll.u32 %v2563_v24, 23  ;;  %vm2788_vm9 = vcmp.eq.s32.totalorder %v2786_v46, 0  ;;  %v2692_v47 = vsel %vm2266_vm7, nan, %v2691_v3 }
 0x1aa   :  { %v2471_v32 = vsel %vm4379_vm6, 0, %v2469_v34  ;;  %v3149_v58 = vmul.f32 %v3115_v27, %v2277_v9  ;;  %v2572_v16 = vsub.s32 4, %v4322_v11  ;;  %vm2488_vm6 = vcmp.lt.s32.totalorder %v4099_v28, 0 }
 0x1ab   :  { %v3463_v37 = vpop.eup %3462  ;;  %v2565_v42 = vor.u32 4788187, %v2564_v26  ;;  %v2568_v35 = vcvt.s32.f32 %v2561_v21  ;;  %v2475_v53 = vadd.s32 3, %v2471_v32  ;;  %vm2487_vm7 = vcmp.le.f32.partialorder %v2486_v50, 0.7853982 }
 0x1ac   :  { %v3465_v56 = vpop.eup %3464  ;;  %v2378_v33 = vxor.u32 2147483648, %v3463_v37  ;;  %v3061_v2 = vadd.s32 256, %v4313_v38  ;;  %v3062_v7 = vadd.s32 384, %v4313_v38  ;;  %v2889_v23 = vand.u32 3, %v2471_v32 }
 0x1ad   :  { %v2375_v43 = vxor.u32 2147483648, %v3465_v56  ;;  %v3467_v10 = vpop.eup %3466  ;;  %v2566_v54 = vand.u32 2147483647, %v2565_v42  ;;  %v2476_v51 = vand.u32 3, %v2475_v53  ;;  %vm2474_vm3 = vweird.f32 %v4091_v30 }
 0x1ae   :  { %v2379_v5 = vsel %vm2377_vm4, %v2378_v33, %v3465_v56  ;;  %v2793_v45 = vsel %vm2791_vm5, %v2378_v33, %v3465_v56  ;;  %v3469_v40 = vpop.eup %3468  ;;  %v2482_v41 = vxor.u32 2147483648, %v3467_v10  ;;  %v3081_v50 = vand.u32 1, %v3061_v2 }
 0x1af   :  { %v2376_v48 = vsel %vm2374_vm2, %v3463_v37, %v2375_v43  ;;  %v2790_v15 = vsel %vm2788_vm9, %v3463_v37, %v2375_v43  ;;  %v2569_v60 = vmul.f32 %v2568_v35, %v2566_v54  ;;  %v2479_v13 = vxor.u32 2147483648, %v3469_v40 }
 0x1b0   :  { %v2380_v57 = vsel %vm2373_vm1, %v2376_v48, %v2379_v5  ;;  %v2794_v6 = vsel %vm2787_vm8, %v2790_v15, %v2793_v45  ;;  %vm2478_vm10 = vcmp.eq.s32.totalorder %v2476_v51, 0  ;;  %vm2477_vm12 = vcmp.lt.s32.totalorder %v2476_v51, 2  ;;  %v3052_v48 = vpop.permute.xlu0 %3051 }
 0x1b1   :  { %v2381_v25 = vsel %vm2370_vm11, nan, %v2380_v57  ;;  %v2795_v46 = vsel %vm2370_vm11, nan, %v2794_v6  ;;  %v2570_v27 = vxor.u32 2147483648, %v2569_v60  ;;  %vm2481_vm11 = vcmp.eq.s32.totalorder %v2476_v51, 2  ;;  %v3482_v51 = vld [vmem:[#allocation5] sm:$0xf] }
 0x1b2   :  { %v3150_v49 = vmul.f32 %v3116_v8, %v2381_v25  ;;  %v3123_v4 = vcombine.low %v2692_v47, %v2795_v46  ;;  %v2573_v8 = vsel %vm2488_vm6, %v2572_v16, %v4322_v11  ;;  %v2480_v56 = vsel %vm2478_vm10, %v3467_v10, %v2479_v13 }
 0x1b3   :  { %v2571_v12 = vsel %vm2488_vm6, %v2570_v27, %v2569_v60  ;;  %v2575_v37 = vsel %vm2487_vm7, 0, %v2573_v8  ;;  %v2483_v33 = vsel %vm2481_vm11, %v2482_v41, %v3469_v40  ;;  %v3088_v11 = vand.u32 1, %v3062_v7 }
 0x1b4   :  { %v4419_v34 = vrot.slane %v3123_v4, %v4387_v36  ;;  %v3157_v63 = vcombine.low %v3149_v58, %v3150_v49  ;;  %v2574_v29 = vsel %vm2487_vm7, %v4099_v28, %v2571_v12  ;;  %v2579_v24 = vadd.s32 3, %v2575_v37 }
 0x1b5   :  { %3470 = vcosq.f32 %v2574_v29  ;;  %vm2891_vm13 = vcmp.eq.s32.totalorder %v2889_v23, 0  ;;  %vm2894_vm14 = vcmp.eq.s32.totalorder %v2889_v23, 2  ;;  %v2992_v3 = vand.u32 3, %v2575_v37 }
 0x1b6   :  { %v4423_v52 = vrot.slane %v3157_v63, %v4387_v36  ;;  %3472 = vsinq.f32 %v2574_v29  ;;  %v2484_v21 = vsel %vm2477_vm12, %v2480_v56, %v2483_v33  ;;  %v2893_v26 = vsel %vm2891_vm13, %v3467_v10, %v2479_v13 }
 0x1b7   :  { %v2896_v43 = vsel %vm2894_vm14, %v2482_v41, %v3469_v40  ;;  %v2580_v9 = vand.u32 3, %v2579_v24  ;;  %v3043_v5 = vsel %vm3042_vm15, %v4275_v39, %v4305_v59  ;;  %v3046_v45 = vsel %vm3042_vm15, %v4305_v59, %v4299_v1 }
 0x1b8   :  { %vm4439_vm1 = vcmp.eq.s32.totalorder %v3081_v50, 0  ;;  %v3002_v15 = vmul.f32 1.442695, %v4208_v0  ;;  %vm4444_vm2 = vcmp.eq.s32.totalorder %v3088_v11, 0  ;;  %vm2890_vm4 = vcmp.lt.s32.totalorder %v2889_v23, 2 }
 0x1b9   :  { %v3006_v10 = vmul.f32 1.442695, %v4210_v44  ;;  %v3004_v32 = vmul.f32 1.442695, %v4216_v19  ;;  %v2485_v1 = vsel %vm2474_vm3, nan, %v2484_v21  ;;  %v2897_v59 = vsel %vm2890_vm4, %v2893_v26, %v2896_v43 }
 0x1ba   :  { %vm2993_vm15 = vcmp.lt.s32.totalorder %v2992_v3, 2  ;;  %vm2994_vm5 = vcmp.eq.s32.totalorder %v2992_v3, 0  ;;  %v3057_v0 = vsel %vm3055_vm0, %v4319_v22, %v3052_v48  ;;  %vm2581_vm8 = vcmp.lt.s32.totalorder %v2580_v9, 2 }
 0x1bb   :  { %vm2585_vm9 = vcmp.eq.s32.totalorder %v2580_v9, 2  ;;  %vm2997_vm6 = vcmp.eq.s32.totalorder %v2992_v3, 2  ;;  %vm2582_vm7 = vcmp.eq.s32.totalorder %v2580_v9, 0  ;;  %v3056_v19 = vsel %vm3055_vm0, %v3052_v48, %v4353_v31 }
 0x1bc   :  { %v2898_v25 = vsel %vm2474_vm3, nan, %v2897_v59  ;;  %v3117_v49 = vsel %vm4439_vm1, %v3043_v5, %v3057_v0  ;;  %vm2578_vm10 = vweird.f32 %v4099_v28  ;;  %v3008_v16 = vmul.f32 1.442695, %v4218_v20 }
 0x1bd   :  { %v3151_v60 = vmul.f32 %v3117_v49, %v2485_v1  ;;  %v3118_v38 = vsel %vm4444_vm2, %v3046_v45, %v3056_v19  ;;  %3474 = vpow2.f32 %v3002_v15  ;;  %vm3239_vm0 = vcmp.lt.s32.totalorder %v3012_v61, 512 }
 0x1be   :  { %3476 = vpow2.f32 %v3006_v10 }
 0x1bf   :  { %v3471_v39 = vpop.eup %3470  ;;  %3478 = vpow2.f32 %v3004_v32 }
 0x1c0   :  { %v3473_v57 = vpop.eup %3472  ;;  %v2586_v6 = vxor.u32 2147483648, %v3471_v39  ;;  %3480 = vpow2.f32 %v3008_v16 }
 0x1c1   :  { %v2583_v58 = vxor.u32 2147483648, %v3473_v57 }
 0x1c2   :  { %v2587_v44 = vsel %vm2585_vm9, %v2586_v6, %v3473_v57  ;;  %v2999_v54 = vsel %vm2997_vm6, %v2586_v6, %v3473_v57 }
 0x1c3   :  { %v2584_v35 = vsel %vm2582_vm7, %v3471_v39, %v2583_v58  ;;  %v2996_v46 = vsel %vm2994_vm5, %v3471_v39, %v2583_v58 }
 0x1c4   :  { %v2588_v22 = vsel %vm2581_vm8, %v2584_v35, %v2587_v44  ;;  %v3000_v4 = vsel %vm2993_vm15, %v2996_v46, %v2999_v54 }
 0x1c5   :  { %v2589_v40 = vsel %vm2578_vm10, nan, %v2588_v22  ;;  %v3001_v53 = vsel %vm2578_vm10, nan, %v3000_v4 }
 0x1c6   :  { %v3124_v30 = vcombine.low %v2898_v25, %v3001_v53  ;;  %v3152_v31 = vmul.f32 %v3118_v38, %v2589_v40 }
 0x1c7   :  { %v3475_v13 = vpop.eup %3474 }
 0x1c8   :  { %v3138_v63 = vrot.slane %v3124_v30, %v4387_v36  ;;  %v3158_v27 = vcombine.low %v3151_v60, %v3152_v31  ;;  %v3477_v37 = vpop.eup %3476 }
 0x1c9   :  { %v3479_v7 = vpop.eup %3478 }
 0x1ca   :  { %v3139_v28 = vcombine.low %v4419_v34, %v3138_v63  ;;  %v3172_v12 = vrot.slane %v3158_v27, %v4387_v36  ;;  %v3481_v50 = vpop.eup %3480 }
 0x1cc   :  { %v3146_v20 = vrot.slane %v3139_v28, %v4387_v36  ;;  %v3173_v8 = vcombine.low %v4423_v52, %v3172_v12 }
 0x1ce   :  { %v3148_v29 = vmul.f32 %v3482_v51, %v3146_v20  ;;  %v3180_v2 = vrot.slane %v3173_v8, %v4387_v36 }
 0x1d0   :  { %v3182_v41 = vadd.f32 %v3180_v2, %v3148_v29 }
 0x1d2   :  { %v3187_v23 = vrot.slane %v3182_v41, %v3014_v18  ;;  %v3191_v34 = vrot.slane %v3182_v41, %v3018_v55  ;;  %v3195_v24 = vrot.slane %v3182_v41, %v3022_v17  ;;  %v3199_v52 = vrot.slane %v3182_v41, %v3026_v14 }
 0x1d4   :  { %v3204_v56 = vmul.f32 %v3475_v13, %v3187_v23  ;;  %v3205_v33 = vmul.f32 %v3479_v7, %v3191_v34  ;;  %v3206_v11 = vmul.f32 %v3477_v37, %v3195_v24  ;;  %v3207_v3 = vmul.f32 %v3481_v50, %v3199_v52 }
 0x1d6   :  { %v3212_v21 = vcombine.low %v3204_v56, %v3205_v33  ;;  %v3213_v26 = vcombine.low %v3206_v11, %v3207_v3 }
 0x1d8   :  { %v3220_v43 = vrot.slane %v3212_v21, %v4387_v36  ;;  %v3227_v18 = vrot.slane %v3213_v26, %v4387_v36 }
 0x1da   :  { %v3228_v55 = vcombine.low %v3220_v43, %v3227_v18 }
 0x1dc   :  { %v3235_v17 = vrot.slane %v3228_v55, %v4387_v36 }
 0x1de   :  { %3241 = vst.msk [vmem:[#allocation8] sm:$0xf] %vm3239_vm0, %v3235_v17 }
 0x1df   :  { %3560 = shalt.err (!%p3557_p0)
}
 0x1e0   :  { %s3561_s28 = scalar_lea.hbm %s4501_s3, 64 }
 0x1e1   :  { %p3562_p1 = scmp.ne.s32.totalorder %s4501_s3, %s3561_s28  ;;  %p3565_p2 = scmp.lt.u32.totalorder %s3561_s28, %s4501_s3 }
 0x1e3   :  { %p3567_p3 = pnand %p3565_p2, %p3562_p1 }
 0x1e5   :  { %3570 = shalt.err (!%p3567_p3)
}
 0x1e6   :  { %3251 = dma.vmem_to_hbm [thread:$0]  %s3249_s24, 64, %s4501_s3, [#allocation4]  }
 0x1e7   :  { %3575 = dma.done.wait [#allocation4], 64  }
 0x1e8   :  { %3576 = vsyncadd [#allocation4], 4294967232 }
 0x1e9   :  { %3255 = vsyncpa [#allocation3], 1 }
 0x1ea   :  { %3256 = vsyncpa [#allocation6], 1 }
 0x1eb   :  { %3257 = vsyncpa [#allocation4], 1 }

</bundles_post_ra>
